<compile_context>
chip_gen: v5e
topology: v5e:2x2
jax: 0.10.0
libtpu: 0.0.40
codegen_flags: <defaults>
</compile_context>

<pallas_src>
import functools

import jax
import jax.numpy as jnp
from jax.experimental import pallas as pl
from jax.experimental.pallas import tpu as pltpu


# ----------------------------------------------------------------------------
# Helpers
# ----------------------------------------------------------------------------

def _token_tile(n, blocks=2):
    """Token-dim tile: 2 lane-aligned blocks if possible (v7x megacore), else full."""
    if n % blocks == 0 and (n // blocks) % 128 == 0:
        return n // blocks
    return n


# ----------------------------------------------------------------------------
# Pallas kernels (channel-major token layout: activations are [C, Ntile])
# ----------------------------------------------------------------------------

def _linear_kernel(x_ref, wt_ref, b_ref, o_ref, *, relu):
    """o = [relu](wT @ x + b); x: [Cin, tn], wT: [Cout, Cin], b: [Cout, 1]."""
    y = jnp.dot(wt_ref[...], x_ref[...], preferred_element_type=jnp.float32)
    y = y + b_ref[...]
    if relu:
        y = jnp.maximum(y, 0.0)
    o_ref[...] = y


def _linear_add_kernel(x_ref, wt_ref, b_ref, y1_ref, o_ref, *, relu):
    """Fused FNO layer tail: o = [relu](spectral_branch + wT @ x + b)."""
    y = jnp.dot(wt_ref[...], x_ref[...], preferred_element_type=jnp.float32)
    y = y + b_ref[...] + y1_ref[...]
    if relu:
        y = jnp.maximum(y, 0.0)
    o_ref[...] = y


def _fc_head_kernel(x_ref, w1t_ref, b1_ref, w2t_ref, b2_ref, o_ref):
    """Fused fc1 + ReLU + fc2; intermediate [128, tn] stays on chip."""
    h = jnp.dot(w1t_ref[...], x_ref[...], preferred_element_type=jnp.float32)
    h = jnp.maximum(h + b1_ref[...], 0.0)
    o_ref[...] = jnp.dot(w2t_ref[...], h,
                         preferred_element_type=jnp.float32) + b2_ref[...]


def _spectral_modes_kernel(xr_ref, xi_ref, wr_ref, ws_ref, wd_ref,
                           or_ref, oi_ref):
    """Mode-batched complex matmul via Gauss 3-multiplication.

    xr/xi: [Mb, B, Cin]; wr = Re(w), ws = Re(w)+Im(w), wd = Im(w)-Re(w)
    (all [Mb, Cin, Cout]).  real = k1 - k2, imag = k1 + k3.
    """
    xr = xr_ref[...]
    xi = xi_ref[...]
    k1 = jnp.einsum('mbi,mio->mbo', xr + xi, wr_ref[...],
                    preferred_element_type=jnp.float32)
    k2 = jnp.einsum('mbi,mio->mbo', xi, ws_ref[...],
                    preferred_element_type=jnp.float32)
    k3 = jnp.einsum('mbi,mio->mbo', xr, wd_ref[...],
                    preferred_element_type=jnp.float32)
    or_ref[...] = k1 - k2
    oi_ref[...] = k1 + k3


# ----------------------------------------------------------------------------
# Pallas wrappers
# ----------------------------------------------------------------------------

def pallas_linear_cf(x, wt, b, *, relu=False):
    """x: [Cin, N], wt: [Cout, Cin], b: [Cout] -> [Cout, N] (lane-dense)."""
    Cin, N = x.shape
    Cout = wt.shape[0]
    tn = _token_tile(N)
    return pl.pallas_call(
        functools.partial(_linear_kernel, relu=relu),
        out_shape=jax.ShapeDtypeStruct((Cout, N), jnp.float32),
        grid_spec=pltpu.PrefetchScalarGridSpec(
            num_scalar_prefetch=0,
            grid=(N // tn,),
            in_specs=[
                pl.BlockSpec((Cin, tn), lambda i: (0, i)),
                pl.BlockSpec((Cout, Cin), lambda i: (0, 0)),
                pl.BlockSpec((Cout, 1), lambda i: (0, 0)),
            ],
            out_specs=pl.BlockSpec((Cout, tn), lambda i: (0, i)),
        ),
        compiler_params=pltpu.CompilerParams(
            dimension_semantics=("parallel",)),
    )(x, wt, b.reshape(Cout, 1))


def pallas_linear_add_cf(x, wt, b, y1, *, relu=False):
    """Fused (wT @ x + b) + y1 [+ ReLU].  x,y1: [C, N], wt: [C, C]."""
    Cin, N = x.shape
    Cout = wt.shape[0]
    tn = _token_tile(N)
    return pl.pallas_call(
        functools.partial(_linear_add_kernel, relu=relu),
        out_shape=jax.ShapeDtypeStruct((Cout, N), jnp.float32),
        grid_spec=pltpu.PrefetchScalarGridSpec(
            num_scalar_prefetch=0,
            grid=(N // tn,),
            in_specs=[
                pl.BlockSpec((Cin, tn), lambda i: (0, i)),
                pl.BlockSpec((Cout, Cin), lambda i: (0, 0)),
                pl.BlockSpec((Cout, 1), lambda i: (0, 0)),
                pl.BlockSpec((Cout, tn), lambda i: (0, i)),
            ],
            out_specs=pl.BlockSpec((Cout, tn), lambda i: (0, i)),
        ),
        compiler_params=pltpu.CompilerParams(
            dimension_semantics=("parallel",)),
    )(x, wt, b.reshape(Cout, 1), y1)


def pallas_fc_head(x, w1t, b1, w2t, b2):
    """Fused fc1 + ReLU + fc2.  x: [width, N] -> [num_heads, N]."""
    Cin, N = x.shape
    Hmid = w1t.shape[0]
    Cout = w2t.shape[0]
    tn = _token_tile(N)
    return pl.pallas_call(
        _fc_head_kernel,
        out_shape=jax.ShapeDtypeStruct((Cout, N), jnp.float32),
        grid_spec=pltpu.PrefetchScalarGridSpec(
            num_scalar_prefetch=0,
            grid=(N // tn,),
            in_specs=[
                pl.BlockSpec((Cin, tn), lambda i: (0, i)),
                pl.BlockSpec((Hmid, Cin), lambda i: (0, 0)),
                pl.BlockSpec((Hmid, 1), lambda i: (0, 0)),
                pl.BlockSpec((Cout, Hmid), lambda i: (0, 0)),
                pl.BlockSpec((Cout, 1), lambda i: (0, 0)),
            ],
            out_specs=pl.BlockSpec((Cout, tn), lambda i: (0, i)),
        ),
        compiler_params=pltpu.CompilerParams(
            dimension_semantics=("parallel",)),
    )(x, w1t, b1.reshape(Hmid, 1), w2t, b2.reshape(Cout, 1))


def pallas_spectral_modes(xr, xi, wr, ws, wd):
    """xr/xi: [M, B, C]; wr/ws/wd: [M, C, C] -> (real, imag) [M, B, C]."""
    M, B, C = xr.shape
    G = 2 if M % 2 == 0 else 1      # 2 mode-groups so both v7x TCs get work
    Mb = M // G
    bx = pl.BlockSpec((Mb, B, C), lambda i: (i, 0, 0))
    bw = pl.BlockSpec((Mb, C, C), lambda i: (i, 0, 0))
    return pl.pallas_call(
        _spectral_modes_kernel,
        out_shape=(jax.ShapeDtypeStruct((M, B, C), jnp.float32),
                   jax.ShapeDtypeStruct((M, B, C), jnp.float32)),
        grid_spec=pltpu.PrefetchScalarGridSpec(
            num_scalar_prefetch=0,
            grid=(G,),
            in_specs=[bx, bx, bw, bw, bw],
            out_specs=(bx, bx),
        ),
        compiler_params=pltpu.CompilerParams(
            dimension_semantics=("parallel",)),
    )(xr, xi, wr, ws, wd)


# ----------------------------------------------------------------------------
# SpectralConv2d (FFT in plain JAX, mode mixing in Pallas)
# ----------------------------------------------------------------------------

def spectral_conv2d_cf(x_cf, wr, ws, wd, modes1, modes2):
    """x_cf: [C, B, H, W] f32; wr/ws/wd: [M, C, C] f32 (Gauss mode-major)."""
    C, B, H, W = x_cf.shape
    m1, m2 = modes1, modes2
    # TODO(synk): FFT/IFFT have no Pallas equivalent; performed with jnp.fft.
    x_ft = jnp.fft.rfft2(x_cf)                        # [C, B, H, W//2+1] c64
    low = x_ft[:, :, :m1, :m2]                        # [C, B, m1, m2]
    high = x_ft[:, :, H - m1:, :m2]                   # [C, B, m1, m2]

    xm = jnp.stack([low, high], axis=0)               # [2, C, B, m1, m2]
    xm = jnp.transpose(xm, (0, 3, 4, 2, 1)).reshape(2 * m1 * m2, B, C)

    orr, oii = pallas_spectral_modes(
        jnp.real(xm).astype(jnp.float32), jnp.imag(xm).astype(jnp.float32),
        wr, ws, wd)

    om = jax.lax.complex(orr, oii).reshape(2, m1, m2, B, C)
    om = jnp.transpose(om, (0, 4, 3, 1, 2))           # [2, C, B, m1, m2]

    out_ft = jnp.zeros_like(x_ft)
    out_ft = out_ft.at[:, :, :m1, :m2].set(om[0])
    out_ft = out_ft.at[:, :, H - m1:, :m2].set(om[1])
    return jnp.fft.irfft2(out_ft, s=(H, W))           # [C, B, H, W] f32


# ----------------------------------------------------------------------------
# Full FNOBlock2d forward (channel-major token layout [C, N] internally)
# ----------------------------------------------------------------------------

def fno_block2d_forward(x, kp, *, modes1, modes2):
    """x: [B, inputHeads, H, W] -> [B, num_heads, H, W]."""
    B, Cin, H, W = x.shape
    width = kp["fc0_wt"].shape[0]
    num_heads = kp["fc2_wt"].shape[0]
    N = B * H * W

    # NCHW -> channel-major tokens [Cin, N] (only input-side transpose).
    x_cf = jnp.transpose(x, (1, 0, 2, 3)).reshape(Cin, N)

    # fc0 lift
    h = pallas_linear_cf(x_cf, kp["fc0_wt"], kp["fc0_b"], relu=False)

    # 4 Fourier layers: x = relu(SpectralConv(x) + 1x1Conv(x)) (no relu last)
    for li in range(4):
        h_4d = h.reshape(width, B, H, W)
        x1 = spectral_conv2d_cf(h_4d, kp[f"conv{li}_wr"], kp[f"conv{li}_ws"],
                                kp[f"conv{li}_wd"], modes1, modes2)
        h = pallas_linear_add_cf(h, kp[f"w{li}_wt"], kp[f"w{li}_b"],
                                 x1.reshape(width, N), relu=(li < 3))

    # fused fc1 + ReLU + fc2 -> lane-dense [num_heads, N]
    out = pallas_fc_head(h, kp["fc1_wt"], kp["fc1_b"],
                         kp["fc2_wt"], kp["fc2_b"])
    return jnp.transpose(out.reshape(num_heads, B, H, W), (1, 0, 2, 3))


# ----------------------------------------------------------------------------
# One-time parameter re-layout for the kernels
# ----------------------------------------------------------------------------

def prepare_params(params):
    """Torch-style params -> kernel layout (transposed weights, Gauss spectral)."""
    kp = {}
    kp["fc0_wt"] = params["fc0_w"].T                  # [width, in_heads]
    kp["fc0_b"] = params["fc0_b"]
    for li in range(4):
        wm = jnp.stack([params[f"conv{li}_w1"], params[f"conv{li}_w2"]],
                       axis=0)                        # [2, Ci, Co, m1, m2]
        _, Ci, Co, m1, m2 = wm.shape
        wm = jnp.transpose(wm, (0, 3, 4, 1, 2)).reshape(2 * m1 * m2, Ci, Co)
        wr = jnp.real(wm).astype(jnp.float32)
        wi = jnp.imag(wm).astype(jnp.float32)
        kp[f"conv{li}_wr"] = wr                       # Re(w)
        kp[f"conv{li}_ws"] = wr + wi                  # Re(w)+Im(w)
        kp[f"conv{li}_wd"] = wi - wr                  # Im(w)-Re(w)
        kp[f"w{li}_wt"] = params[f"w{li}_w"].T        # [Cout, Cin]
        kp[f"w{li}_b"] = params[f"w{li}_b"]
    kp["fc1_wt"] = params["fc1_w"].T                  # [128, width]
    kp["fc1_b"] = params["fc1_b"]
    kp["fc2_wt"] = params["fc2_w"].T                  # [num_heads, 128]
    kp["fc2_b"] = params["fc2_b"]
    return kp


# ----------------------------------------------------------------------------
# Pure-JAX reference (for correctness check)
# ----------------------------------------------------------------------------

def fno_block2d_reference(x, params, *, modes1, modes2):
    B, Cin, H, W = x.shape
    m1, m2 = modes1, modes2
    h = jnp.transpose(x, (0, 2, 3, 1)) @ params["fc0_w"] + params["fc0_b"]
    h = jnp.transpose(h, (0, 3, 1, 2))                  # [B, width, H, W]
    for li in range(4):
        x_ft = jnp.fft.rfft2(h)
        out_ft = jnp.zeros_like(x_ft)
        out_ft = out_ft.at[:, :, :m1, :m2].set(
            jnp.einsum("bixy,ioxy->boxy", x_ft[:, :, :m1, :m2],
                       params[f"conv{li}_w1"]))
        out_ft = out_ft.at[:, :, H - m1:, :m2].set(
            jnp.einsum("bixy,ioxy->boxy", x_ft[:, :, H - m1:, :m2],
                       params[f"conv{li}_w2"]))
        x1 = jnp.fft.irfft2(out_ft, s=(H, W))
        x2 = (jnp.einsum("bihw,io->bohw", h, params[f"w{li}_w"])
              + params[f"w{li}_b"][None, :, None, None])
        h = x1 + x2
        if li < 3:
            h = jnp.maximum(h, 0.0)
    h = jnp.transpose(h, (0, 2, 3, 1))
    h = jnp.maximum(h @ params["fc1_w"] + params["fc1_b"], 0.0)
    h = h @ params["fc2_w"] + params["fc2_b"]
    return jnp.transpose(h, (0, 3, 1, 2))


# ----------------------------------------------------------------------------
# Deterministic parameter init (synthetic; shapes follow the PyTorch __init__)
# ----------------------------------------------------------------------------

def init_params(key, in_heads, width, modes1, modes2, num_heads, hidden=128):
    ks = iter(jax.random.split(key, 64))
    params = {}

    def lin(cin, cout):
        bound = 1.0 / jnp.sqrt(cin)
        w = jax.random.uniform(next(ks), (cin, cout), jnp.float32, -bound, bound)
        b = jax.random.uniform(next(ks), (cout,), jnp.float32, -bound, bound)
        return w, b

    params["fc0_w"], params["fc0_b"] = lin(in_heads, width)
    for li in range(4):
        scale = 1.0 / (width * width)
        for wi in (1, 2):
            re = scale * jax.random.uniform(
                next(ks), (width, width, modes1, modes2), jnp.float32)
            im = scale * jax.random.uniform(
                next(ks), (width, width, modes1, modes2), jnp.float32)
            params[f"conv{li}_w{wi}"] = jax.lax.complex(re, im)
        params[f"w{li}_w"], params[f"w{li}_b"] = lin(width, width)
    params["fc1_w"], params["fc1_b"] = lin(width, hidden)
    params["fc2_w"], params["fc2_b"] = lin(hidden, num_heads)
    return params


# ----------------------------------------------------------------------------

if __name__ == "__main__":
    B, IN_HEADS, H, W = 2, 4, 16, 16
    MODES1, MODES2, WIDTH, NUM_HEADS = 4, 4, 32, 4

    key = jax.random.PRNGKey(0)
    kx, kpkey = jax.random.split(key)
    x = jax.random.normal(kx, (B, IN_HEADS, H, W), dtype=jnp.float32)
    params = init_params(kpkey, IN_HEADS, WIDTH, MODES1, MODES2, NUM_HEADS)
    kparams = prepare_params(params)   # one-time kernel-layout weights

    fwd = jax.jit(functools.partial(fno_block2d_forward,
                                    modes1=MODES1, modes2=MODES2))
    out = jax.block_until_ready(fwd(x, kparams))

    assert out.shape == (B, NUM_HEADS, H, W), out.shape
    ref = fno_block2d_reference(x, params, modes1=MODES1, modes2=MODES2)
    assert jnp.allclose(out, ref, rtol=1e-4, atol=1e-4), \
        float(jnp.max(jnp.abs(out - ref)))

    print("KERNEL_OK")
</pallas_src>

<mosaic_0001>
module attributes {stable_mosaic.version = 11 : i64} {
  func.func @_linear_kernel(%arg0: i32, %arg1: memref<4x256xf32, #tpu.memory_space<vmem>>, %arg2: memref<32x4xf32, #tpu.memory_space<vmem>>, %arg3: memref<32x1xf32, #tpu.memory_space<vmem>>, %arg4: memref<32x256xf32, #tpu.memory_space<vmem>>) attributes {dimension_semantics = [#tpu.dimension_semantics<parallel>], iteration_bounds = array<i64: 2>, scalar_prefetch = 0 : i64, scratch_operands = 0 : i64, tpu.core_type = #tpu.core_type<tc>, window_params = [{transform_indices = @transform_0, window_bounds = array<i64: 4, 256>}, {pipeline_mode = #tpu.pipeline_mode<synchronous>, transform_indices = @transform_1, window_bounds = array<i64: 32, 4>}, {pipeline_mode = #tpu.pipeline_mode<synchronous>, transform_indices = @transform_2, window_bounds = array<i64: 32, 1>}, {transform_indices = @transform_3, window_bounds = array<i64: 32, 256>}]} {
    %c0 = arith.constant 0 : index
    %c0_0 = arith.constant 0 : index
    %0 = vector.load %arg2[%c0, %c0_0] : memref<32x4xf32, #tpu.memory_space<vmem>>, vector<32x4xf32>
    %c0_1 = arith.constant 0 : index
    %c0_2 = arith.constant 0 : index
    %1 = vector.load %arg1[%c0_1, %c0_2] : memref<4x256xf32, #tpu.memory_space<vmem>>, vector<4x256xf32>
    %cst = arith.constant dense<0.000000e+00> : vector<32x256xf32>
    %2 = tpu.matmul %0, %1, %cst {dimension_numbers = #tpu.dot_dimension_numbers<[1], [0], [0], [1], [0, 0, 1, 1], [], []>} : vector<32x4xf32>, vector<4x256xf32>, vector<32x256xf32> -> vector<32x256xf32>
    %c0_3 = arith.constant 0 : index
    %c0_4 = arith.constant 0 : index
    %3 = vector.load %arg3[%c0_3, %c0_4] : memref<32x1xf32, #tpu.memory_space<vmem>>, vector<32x1xf32>
    %4 = vector.broadcast %3 : vector<32x1xf32> to vector<32x256xf32>
    %5 = arith.addf %2, %4 : vector<32x256xf32>
    %c0_5 = arith.constant 0 : index
    %c0_6 = arith.constant 0 : index
    %6 = vector.load %arg4[%c0_5, %c0_6] : memref<32x256xf32, #tpu.memory_space<vmem>>, vector<32x256xf32>
    tpu.vector_store %arg4[%c0_5, %c0_6], %5 {strides = array<i32>} : memref<32x256xf32, #tpu.memory_space<vmem>>, vector<32x256xf32>,
    return
  }
  func.func @transform_0(%arg0: i32) -> (i32, i32) {
    %c0_i32 = arith.constant 0 : i32
    %c0_i32_0 = arith.constant 0 : i32
    return %c0_i32, %arg0 : i32, i32
  }
  func.func @transform_1(%arg0: i32) -> (i32, i32) {
    %c0_i32 = arith.constant 0 : i32
    %c0_i32_0 = arith.constant 0 : i32
    %c0_i32_1 = arith.constant 0 : i32
    return %c0_i32, %c0_i32_0 : i32, i32
  }
  func.func @transform_2(%arg0: i32) -> (i32, i32) {
    %c0_i32 = arith.constant 0 : i32
    %c0_i32_0 = arith.constant 0 : i32
    %c0_i32_1 = arith.constant 0 : i32
    return %c0_i32, %c0_i32_0 : i32, i32
  }
  func.func @transform_3(%arg0: i32) -> (i32, i32) {
    %c0_i32 = arith.constant 0 : i32
    %c0_i32_0 = arith.constant 0 : i32
    return %c0_i32, %arg0 : i32, i32
  }
}

module attributes {stable_mosaic.version = 11 : i64} {
  func.func @_spectral_modes_kernel(%arg0: i32, %arg1: memref<16x2x32xf32, #tpu.memory_space<vmem>>, %arg2: memref<16x2x32xf32, #tpu.memory_space<vmem>>, %arg3: memref<16x32x32xf32, #tpu.memory_space<vmem>>, %arg4: memref<16x32x32xf32, #tpu.memory_space<vmem>>, %arg5: memref<16x32x32xf32, #tpu.memory_space<vmem>>, %arg6: memref<16x2x32xf32, #tpu.memory_space<vmem>>, %arg7: memref<16x2x32xf32, #tpu.memory_space<vmem>>) attributes {dimension_semantics = [#tpu.dimension_semantics<parallel>], iteration_bounds = array<i64: 2>, scalar_prefetch = 0 : i64, scratch_operands = 0 : i64, tpu.core_type = #tpu.core_type<tc>, window_params = [{transform_indices = @transform_0, window_bounds = array<i64: 16, 2, 32>}, {transform_indices = @transform_1, window_bounds = array<i64: 16, 2, 32>}, {transform_indices = @transform_2, window_bounds = array<i64: 16, 32, 32>}, {transform_indices = @transform_3, window_bounds = array<i64: 16, 32, 32>}, {transform_indices = @transform_4, window_bounds = array<i64: 16, 32, 32>}, {transform_indices = @transform_5, window_bounds = array<i64: 16, 2, 32>}, {transform_indices = @transform_6, window_bounds = array<i64: 16, 2, 32>}]} {
    %c0 = arith.constant 0 : index
    %c0_0 = arith.constant 0 : index
    %c0_1 = arith.constant 0 : index
    %0 = vector.load %arg1[%c0, %c0_0, %c0_1] : memref<16x2x32xf32, #tpu.memory_space<vmem>>, vector<16x2x32xf32>
    %c0_2 = arith.constant 0 : index
    %c0_3 = arith.constant 0 : index
    %c0_4 = arith.constant 0 : index
    %1 = vector.load %arg2[%c0_2, %c0_3, %c0_4] : memref<16x2x32xf32, #tpu.memory_space<vmem>>, vector<16x2x32xf32>
    %2 = arith.addf %0, %1 : vector<16x2x32xf32>
    %c0_5 = arith.constant 0 : index
    %c0_6 = arith.constant 0 : index
    %c0_7 = arith.constant 0 : index
    %3 = vector.load %arg3[%c0_5, %c0_6, %c0_7] : memref<16x32x32xf32, #tpu.memory_space<vmem>>, vector<16x32x32xf32>
    "tpu.trace_start"() <{level = 10 : i32, message = "mbi,mio->mbo"}> : () -> ()
    %cst = arith.constant dense<0.000000e+00> : vector<16x2x32xf32>
    %4 = tpu.matmul %2, %3, %cst {dimension_numbers = #tpu.dot_dimension_numbers<[2], [1], [1], [2], [0, 0, 0, 1, 1, 2], [0], [0]>} : vector<16x2x32xf32>, vector<16x32x32xf32>, vector<16x2x32xf32> -> vector<16x2x32xf32>
    "tpu.trace_stop"() : () -> ()
    %c0_8 = arith.constant 0 : index
    %c0_9 = arith.constant 0 : index
    %c0_10 = arith.constant 0 : index
    %5 = vector.load %arg4[%c0_8, %c0_9, %c0_10] : memref<16x32x32xf32, #tpu.memory_space<vmem>>, vector<16x32x32xf32>
    "tpu.trace_start"() <{level = 10 : i32, message = "mbi,mio->mbo"}> : () -> ()
    %cst_11 = arith.constant dense<0.000000e+00> : vector<16x2x32xf32>
    %6 = tpu.matmul %1, %5, %cst_11 {dimension_numbers = #tpu.dot_dimension_numbers<[2], [1], [1], [2], [0, 0, 0, 1, 1, 2], [0], [0]>} : vector<16x2x32xf32>, vector<16x32x32xf32>, vector<16x2x32xf32> -> vector<16x2x32xf32>
    "tpu.trace_stop"() : () -> ()
    %c0_12 = arith.constant 0 : index
    %c0_13 = arith.constant 0 : index
    %c0_14 = arith.constant 0 : index
    %7 = vector.load %arg5[%c0_12, %c0_13, %c0_14] : memref<16x32x32xf32, #tpu.memory_space<vmem>>, vector<16x32x32xf32>
    "tpu.trace_start"() <{level = 10 : i32, message = "mbi,mio->mbo"}> : () -> ()
    %cst_15 = arith.constant dense<0.000000e+00> : vector<16x2x32xf32>
    %8 = tpu.matmul %0, %7, %cst_15 {dimension_numbers = #tpu.dot_dimension_numbers<[2], [1], [1], [2], [0, 0, 0, 1, 1, 2], [0], [0]>} : vector<16x2x32xf32>, vector<16x32x32xf32>, vector<16x2x32xf32> -> vector<16x2x32xf32>
    "tpu.trace_stop"() : () -> ()
    %9 = arith.subf %4, %6 : vector<16x2x32xf32>
    %c0_16 = arith.constant 0 : index
    %c0_17 = arith.constant 0 : index
    %c0_18 = arith.constant 0 : index
    %10 = vector.load %arg6[%c0_16, %c0_17, %c0_18] : memref<16x2x32xf32, #tpu.memory_space<vmem>>, vector<16x2x32xf32>
    tpu.vector_store %arg6[%c0_16, %c0_17, %c0_18], %9 {strides = array<i32>} : memref<16x2x32xf32, #tpu.memory_space<vmem>>, vector<16x2x32xf32>,
    %11 = arith.addf %4, %8 : vector<16x2x32xf32>
    %c0_19 = arith.constant 0 : index
    %c0_20 = arith.constant 0 : index
    %c0_21 = arith.constant 0 : index
    %12 = vector.load %arg7[%c0_19, %c0_20, %c0_21] : memref<16x2x32xf32, #tpu.memory_space<vmem>>, vector<16x2x32xf32>
    tpu.vector_store %arg7[%c0_19, %c0_20, %c0_21], %11 {strides = array<i32>} : memref<16x2x32xf32, #tpu.memory_space<vmem>>, vector<16x2x32xf32>,
    return
  }
  func.func @transform_0(%arg0: i32) -> (i32, i32, i32) {
    %c0_i32 = arith.constant 0 : i32
    %c0_i32_0 = arith.constant 0 : i32
    %c0_i32_1 = arith.constant 0 : i32
    return %arg0, %c0_i32, %c0_i32_0 : i32, i32, i32
  }
  func.func @transform_1(%arg0: i32) -> (i32, i32, i32) {
    %c0_i32 = arith.constant 0 : i32
    %c0_i32_0 = arith.constant 0 : i32
    %c0_i32_1 = arith.constant 0 : i32
    return %arg0, %c0_i32, %c0_i32_0 : i32, i32, i32
  }
  func.func @transform_2(%arg0: i32) -> (i32, i32, i32) {
    %c0_i32 = arith.constant 0 : i32
    %c0_i32_0 = arith.constant 0 : i32
    %c0_i32_1 = arith.constant 0 : i32
    return %arg0, %c0_i32, %c0_i32_0 : i32, i32, i32
  }
  func.func @transform_3(%arg0: i32) -> (i32, i32, i32) {
    %c0_i32 = arith.constant 0 : i32
    %c0_i32_0 = arith.constant 0 : i32
    %c0_i32_1 = arith.constant 0 : i32
    return %arg0, %c0_i32, %c0_i32_0 : i32, i32, i32
  }
  func.func @transform_4(%arg0: i32) -> (i32, i32, i32) {
    %c0_i32 = arith.constant 0 : i32
    %c0_i32_0 = arith.constant 0 : i32
    %c0_i32_1 = arith.constant 0 : i32
    return %arg0, %c0_i32, %c0_i32_0 : i32, i32, i32
  }
  func.func @transform_5(%arg0: i32) -> (i32, i32, i32) {
    %c0_i32 = arith.constant 0 : i32
    %c0_i32_0 = arith.constant 0 : i32
    %c0_i32_1 = arith.constant 0 : i32
    return %arg0, %c0_i32, %c0_i32_0 : i32, i32, i32
  }
  func.func @transform_6(%arg0: i32) -> (i32, i32, i32) {
    %c0_i32 = arith.constant 0 : i32
    %c0_i32_0 = arith.constant 0 : i32
    %c0_i32_1 = arith.constant 0 : i32
    return %arg0, %c0_i32, %c0_i32_0 : i32, i32, i32
  }
}

module attributes {stable_mosaic.version = 11 : i64} {
  func.func @_linear_add_kernel(%arg0: i32, %arg1: memref<32x256xf32, #tpu.memory_space<vmem>>, %arg2: memref<32x32xf32, #tpu.memory_space<vmem>>, %arg3: memref<32x1xf32, #tpu.memory_space<vmem>>, %arg4: memref<32x256xf32, #tpu.memory_space<vmem>>, %arg5: memref<32x256xf32, #tpu.memory_space<vmem>>) attributes {dimension_semantics = [#tpu.dimension_semantics<parallel>], iteration_bounds = array<i64: 2>, scalar_prefetch = 0 : i64, scratch_operands = 0 : i64, tpu.core_type = #tpu.core_type<tc>, window_params = [{transform_indices = @transform_0, window_bounds = array<i64: 32, 256>}, {pipeline_mode = #tpu.pipeline_mode<synchronous>, transform_indices = @transform_1, window_bounds = array<i64: 32, 32>}, {pipeline_mode = #tpu.pipeline_mode<synchronous>, transform_indices = @transform_2, window_bounds = array<i64: 32, 1>}, {transform_indices = @transform_3, window_bounds = array<i64: 32, 256>}, {transform_indices = @transform_4, window_bounds = array<i64: 32, 256>}]} {
    %c0 = arith.constant 0 : index
    %c0_0 = arith.constant 0 : index
    %0 = vector.load %arg2[%c0, %c0_0] : memref<32x32xf32, #tpu.memory_space<vmem>>, vector<32x32xf32>
    %c0_1 = arith.constant 0 : index
    %c0_2 = arith.constant 0 : index
    %1 = vector.load %arg1[%c0_1, %c0_2] : memref<32x256xf32, #tpu.memory_space<vmem>>, vector<32x256xf32>
    %cst = arith.constant dense<0.000000e+00> : vector<32x256xf32>
    %2 = tpu.matmul %0, %1, %cst {dimension_numbers = #tpu.dot_dimension_numbers<[1], [0], [0], [1], [0, 0, 1, 1], [], []>} : vector<32x32xf32>, vector<32x256xf32>, vector<32x256xf32> -> vector<32x256xf32>
    %c0_3 = arith.constant 0 : index
    %c0_4 = arith.constant 0 : index
    %3 = vector.load %arg3[%c0_3, %c0_4] : memref<32x1xf32, #tpu.memory_space<vmem>>, vector<32x1xf32>
    %4 = vector.broadcast %3 : vector<32x1xf32> to vector<32x256xf32>
    %5 = arith.addf %2, %4 : vector<32x256xf32>
    %c0_5 = arith.constant 0 : index
    %c0_6 = arith.constant 0 : index
    %6 = vector.load %arg4[%c0_5, %c0_6] : memref<32x256xf32, #tpu.memory_space<vmem>>, vector<32x256xf32>
    %7 = arith.addf %5, %6 : vector<32x256xf32>
    %cst_7 = arith.constant 0.000000e+00 : f32
    %8 = vector.broadcast %cst_7 : f32 to vector<32x256xf32>
    %9 = arith.maximumf %7, %8 : vector<32x256xf32>
    %c0_8 = arith.constant 0 : index
    %c0_9 = arith.constant 0 : index
    %10 = vector.load %arg5[%c0_8, %c0_9] : memref<32x256xf32, #tpu.memory_space<vmem>>, vector<32x256xf32>
    tpu.vector_store %arg5[%c0_8, %c0_9], %9 {strides = array<i32>} : memref<32x256xf32, #tpu.memory_space<vmem>>, vector<32x256xf32>,
    return
  }
  func.func @transform_0(%arg0: i32) -> (i32, i32) {
    %c0_i32 = arith.constant 0 : i32
    %c0_i32_0 = arith.constant 0 : i32
    return %c0_i32, %arg0 : i32, i32
  }
  func.func @transform_1(%arg0: i32) -> (i32, i32) {
    %c0_i32 = arith.constant 0 : i32
    %c0_i32_0 = arith.constant 0 : i32
    %c0_i32_1 = arith.constant 0 : i32
    return %c0_i32, %c0_i32_0 : i32, i32
  }
  func.func @transform_2(%arg0: i32) -> (i32, i32) {
    %c0_i32 = arith.constant 0 : i32
    %c0_i32_0 = arith.constant 0 : i32
    %c0_i32_1 = arith.constant 0 : i32
    return %c0_i32, %c0_i32_0 : i32, i32
  }
  func.func @transform_3(%arg0: i32) -> (i32, i32) {
    %c0_i32 = arith.constant 0 : i32
    %c0_i32_0 = arith.constant 0 : i32
    return %c0_i32, %arg0 : i32, i32
  }
  func.func @transform_4(%arg0: i32) -> (i32, i32) {
    %c0_i32 = arith.constant 0 : i32
    %c0_i32_0 = arith.constant 0 : i32
    return %c0_i32, %arg0 : i32, i32
  }
}

module attributes {stable_mosaic.version = 11 : i64} {
  func.func @_linear_add_kernel(%arg0: i32, %arg1: memref<32x256xf32, #tpu.memory_space<vmem>>, %arg2: memref<32x32xf32, #tpu.memory_space<vmem>>, %arg3: memref<32x1xf32, #tpu.memory_space<vmem>>, %arg4: memref<32x256xf32, #tpu.memory_space<vmem>>, %arg5: memref<32x256xf32, #tpu.memory_space<vmem>>) attributes {dimension_semantics = [#tpu.dimension_semantics<parallel>], iteration_bounds = array<i64: 2>, scalar_prefetch = 0 : i64, scratch_operands = 0 : i64, tpu.core_type = #tpu.core_type<tc>, window_params = [{transform_indices = @transform_0, window_bounds = array<i64: 32, 256>}, {pipeline_mode = #tpu.pipeline_mode<synchronous>, transform_indices = @transform_1, window_bounds = array<i64: 32, 32>}, {pipeline_mode = #tpu.pipeline_mode<synchronous>, transform_indices = @transform_2, window_bounds = array<i64: 32, 1>}, {transform_indices = @transform_3, window_bounds = array<i64: 32, 256>}, {transform_indices = @transform_4, window_bounds = array<i64: 32, 256>}]} {
    %c0 = arith.constant 0 : index
    %c0_0 = arith.constant 0 : index
    %0 = vector.load %arg2[%c0, %c0_0] : memref<32x32xf32, #tpu.memory_space<vmem>>, vector<32x32xf32>
    %c0_1 = arith.constant 0 : index
    %c0_2 = arith.constant 0 : index
    %1 = vector.load %arg1[%c0_1, %c0_2] : memref<32x256xf32, #tpu.memory_space<vmem>>, vector<32x256xf32>
    %cst = arith.constant dense<0.000000e+00> : vector<32x256xf32>
    %2 = tpu.matmul %0, %1, %cst {dimension_numbers = #tpu.dot_dimension_numbers<[1], [0], [0], [1], [0, 0, 1, 1], [], []>} : vector<32x32xf32>, vector<32x256xf32>, vector<32x256xf32> -> vector<32x256xf32>
    %c0_3 = arith.constant 0 : index
    %c0_4 = arith.constant 0 : index
    %3 = vector.load %arg3[%c0_3, %c0_4] : memref<32x1xf32, #tpu.memory_space<vmem>>, vector<32x1xf32>
    %4 = vector.broadcast %3 : vector<32x1xf32> to vector<32x256xf32>
    %5 = arith.addf %2, %4 : vector<32x256xf32>
    %c0_5 = arith.constant 0 : index
    %c0_6 = arith.constant 0 : index
    %6 = vector.load %arg4[%c0_5, %c0_6] : memref<32x256xf32, #tpu.memory_space<vmem>>, vector<32x256xf32>
    %7 = arith.addf %5, %6 : vector<32x256xf32>
    %c0_7 = arith.constant 0 : index
    %c0_8 = arith.constant 0 : index
    %8 = vector.load %arg5[%c0_7, %c0_8] : memref<32x256xf32, #tpu.memory_space<vmem>>, vector<32x256xf32>
    tpu.vector_store %arg5[%c0_7, %c0_8], %7 {strides = array<i32>} : memref<32x256xf32, #tpu.memory_space<vmem>>, vector<32x256xf32>,
    return
  }
  func.func @transform_0(%arg0: i32) -> (i32, i32) {
    %c0_i32 = arith.constant 0 : i32
    %c0_i32_0 = arith.constant 0 : i32
    return %c0_i32, %arg0 : i32, i32
  }
  func.func @transform_1(%arg0: i32) -> (i32, i32) {
    %c0_i32 = arith.constant 0 : i32
    %c0_i32_0 = arith.constant 0 : i32
    %c0_i32_1 = arith.constant 0 : i32
    return %c0_i32, %c0_i32_0 : i32, i32
  }
  func.func @transform_2(%arg0: i32) -> (i32, i32) {
    %c0_i32 = arith.constant 0 : i32
    %c0_i32_0 = arith.constant 0 : i32
    %c0_i32_1 = arith.constant 0 : i32
    return %c0_i32, %c0_i32_0 : i32, i32
  }
  func.func @transform_3(%arg0: i32) -> (i32, i32) {
    %c0_i32 = arith.constant 0 : i32
    %c0_i32_0 = arith.constant 0 : i32
    return %c0_i32, %arg0 : i32, i32
  }
  func.func @transform_4(%arg0: i32) -> (i32, i32) {
    %c0_i32 = arith.constant 0 : i32
    %c0_i32_0 = arith.constant 0 : i32
    return %c0_i32, %arg0 : i32, i32
  }
}

module attributes {stable_mosaic.version = 11 : i64} {
  func.func @_fc_head_kernel(%arg0: i32, %arg1: memref<32x256xf32, #tpu.memory_space<vmem>>, %arg2: memref<128x32xf32, #tpu.memory_space<vmem>>, %arg3: memref<128x1xf32, #tpu.memory_space<vmem>>, %arg4: memref<4x128xf32, #tpu.memory_space<vmem>>, %arg5: memref<4x1xf32, #tpu.memory_space<vmem>>, %arg6: memref<4x256xf32, #tpu.memory_space<vmem>>) attributes {dimension_semantics = [#tpu.dimension_semantics<parallel>], iteration_bounds = array<i64: 2>, scalar_prefetch = 0 : i64, scratch_operands = 0 : i64, tpu.core_type = #tpu.core_type<tc>, window_params = [{transform_indices = @transform_0, window_bounds = array<i64: 32, 256>}, {pipeline_mode = #tpu.pipeline_mode<synchronous>, transform_indices = @transform_1, window_bounds = array<i64: 128, 32>}, {pipeline_mode = #tpu.pipeline_mode<synchronous>, transform_indices = @transform_2, window_bounds = array<i64: 128, 1>}, {pipeline_mode = #tpu.pipeline_mode<synchronous>, transform_indices = @transform_3, window_bounds = array<i64: 4, 128>}, {pipeline_mode = #tpu.pipeline_mode<synchronous>, transform_indices = @transform_4, window_bounds = array<i64: 4, 1>}, {transform_indices = @transform_5, window_bounds = array<i64: 4, 256>}]} {
    %c0 = arith.constant 0 : index
    %c0_0 = arith.constant 0 : index
    %0 = vector.load %arg2[%c0, %c0_0] : memref<128x32xf32, #tpu.memory_space<vmem>>, vector<128x32xf32>
    %c0_1 = arith.constant 0 : index
    %c0_2 = arith.constant 0 : index
    %1 = vector.load %arg1[%c0_1, %c0_2] : memref<32x256xf32, #tpu.memory_space<vmem>>, vector<32x256xf32>
    %cst = arith.constant dense<0.000000e+00> : vector<128x256xf32>
    %2 = tpu.matmul %0, %1, %cst {dimension_numbers = #tpu.dot_dimension_numbers<[1], [0], [0], [1], [0, 0, 1, 1], [], []>} : vector<128x32xf32>, vector<32x256xf32>, vector<128x256xf32> -> vector<128x256xf32>
    %c0_3 = arith.constant 0 : index
    %c0_4 = arith.constant 0 : index
    %3 = vector.load %arg3[%c0_3, %c0_4] : memref<128x1xf32, #tpu.memory_space<vmem>>, vector<128x1xf32>
    %4 = vector.broadcast %3 : vector<128x1xf32> to vector<128x256xf32>
    %5 = arith.addf %2, %4 : vector<128x256xf32>
    %cst_5 = arith.constant 0.000000e+00 : f32
    %6 = vector.broadcast %cst_5 : f32 to vector<128x256xf32>
    %7 = arith.maximumf %5, %6 : vector<128x256xf32>
    %c0_6 = arith.constant 0 : index
    %c0_7 = arith.constant 0 : index
    %8 = vector.load %arg4[%c0_6, %c0_7] : memref<4x128xf32, #tpu.memory_space<vmem>>, vector<4x128xf32>
    %cst_8 = arith.constant dense<0.000000e+00> : vector<4x256xf32>
    %9 = tpu.matmul %8, %7, %cst_8 {dimension_numbers = #tpu.dot_dimension_numbers<[1], [0], [0], [1], [0, 0, 1, 1], [], []>} : vector<4x128xf32>, vector<128x256xf32>, vector<4x256xf32> -> vector<4x256xf32>
    %c0_9 = arith.constant 0 : index
    %c0_10 = arith.constant 0 : index
    %10 = vector.load %arg5[%c0_9, %c0_10] : memref<4x1xf32, #tpu.memory_space<vmem>>, vector<4x1xf32>
    %11 = vector.broadcast %10 : vector<4x1xf32> to vector<4x256xf32>
    %12 = arith.addf %9, %11 : vector<4x256xf32>
    %c0_11 = arith.constant 0 : index
    %c0_12 = arith.constant 0 : index
    %13 = vector.load %arg6[%c0_11, %c0_12] : memref<4x256xf32, #tpu.memory_space<vmem>>, vector<4x256xf32>
    tpu.vector_store %arg6[%c0_11, %c0_12], %12 {strides = array<i32>} : memref<4x256xf32, #tpu.memory_space<vmem>>, vector<4x256xf32>,
    return
  }
  func.func @transform_0(%arg0: i32) -> (i32, i32) {
    %c0_i32 = arith.constant 0 : i32
    %c0_i32_0 = arith.constant 0 : i32
    return %c0_i32, %arg0 : i32, i32
  }
  func.func @transform_1(%arg0: i32) -> (i32, i32) {
    %c0_i32 = arith.constant 0 : i32
    %c0_i32_0 = arith.constant 0 : i32
    %c0_i32_1 = arith.constant 0 : i32
    return %c0_i32, %c0_i32_0 : i32, i32
  }
  func.func @transform_2(%arg0: i32) -> (i32, i32) {
    %c0_i32 = arith.constant 0 : i32
    %c0_i32_0 = arith.constant 0 : i32
    %c0_i32_1 = arith.constant 0 : i32
    return %c0_i32, %c0_i32_0 : i32, i32
  }
  func.func @transform_3(%arg0: i32) -> (i32, i32) {
    %c0_i32 = arith.constant 0 : i32
    %c0_i32_0 = arith.constant 0 : i32
    %c0_i32_1 = arith.constant 0 : i32
    return %c0_i32, %c0_i32_0 : i32, i32
  }
  func.func @transform_4(%arg0: i32) -> (i32, i32) {
    %c0_i32 = arith.constant 0 : i32
    %c0_i32_0 = arith.constant 0 : i32
    %c0_i32_1 = arith.constant 0 : i32
    return %c0_i32, %c0_i32_0 : i32, i32
  }
  func.func @transform_5(%arg0: i32) -> (i32, i32) {
    %c0_i32 = arith.constant 0 : i32
    %c0_i32_0 = arith.constant 0 : i32
    return %c0_i32, %arg0 : i32, i32
  }
}

</mosaic_0001>

<bundles_post_ra>
// kernel: fno_block2d_forward.10
= control target key start
LH: loop header
LB: loop body
LE: loop exit
PB: predicated region body
PF: predicated region fallthrough
CT: control target
= control target key end

     0   :  { %s474_s12 = smov 0   ;;  %s476_s13 = smov 0   ;;  %s574_s0 = inlined_call_operand.vmem [shape: f32[4,512], index: 0, kind: input, shape index: {}]   ;;  %s575_s1 = inlined_call_operand.vmem [shape: f32[32,4], index: 1, kind: input, shape index: {}]   ;;  %s576_s2 = inlined_call_operand.vmem [shape: f32[32,1], index: 2, kind: input, shape index: {}]   ;;  %s577_s3 = inlined_call_operand.vmem [shape: f32[32,512], index: 3, kind: output, shape index: {}]  }
   0x1   :  { %s478_s14 = smov 0  }
   0x2 LB: > { %s487_s15 = sadd.s32 4294967295, %s451_s14   ;;  %s489_s16 = sadd.s32 1, %s451_s14   ;;  %s451_s14 = sphi %s478_s14, %s581_s14   ;;  %s447_s13 = sphi %s476_s13, %s580_s13   ;;  %s443_s12 = sphi %s474_s12, %s579_s12  }
   0x3   : > { %s85_s17 = ssub.s32 %s451_s14, %s489_s16  ;;  %s88_s18 = sadd.s32 1, %s447_s13 }
   0x4   : > { %p86_p0 = scmp.eq.s32.totalorder %s85_s17, 0  ;;  %p98_p1 = scmp.ne.s32.totalorder %s447_s13, %s443_s12 }
   0x5   : > { %p99_p2 = scmp.eq.s32.totalorder %s487_s15, 1  ;;  %p380_p3 = scmp.ge.s32.totalorder %s451_s14, 1 }
   0x6   : > { %s497_s19 = scalar_select %p86_p0, %s447_s13, %s88_s18  }
   0x7   : > { %p499_p4 = por %p99_p2, %p98_p1  ;;  %p138_p5 = scmp.lt.s32.totalorder %s451_s14, 3 }
   0x9   : > { %p139_p6 = pnand %p380_p3, %p138_p5 }
   0xa   : > { %s382_s21 = sshll.u32 (!%p139_p6), %s487_s15, 1 }
   0xb   : > { %142 = sbr.rel (%p139_p6) target bundleno = 182 (0xb6), region = 32  ;;  %p162_p7 = scmp.lt.s32.totalorder (!%p139_p6), %s382_s21, 3 }
  0x10   : > { %v453_v0 = vmov 0   ;;  %v175_v1 = vld [vmem:[%s576_s2 + $0x10] sm:$0xff]  ;;  %v173_v2 = vld [vmem:[%s576_s2] sm:$0xff]  ;;  %s583_s21 = smov (!%p162_p7, %s382_s21), 3  ;;  %v176_v4 = vld [vmem:[%s576_s2 + $0x18] sm:$0xff]  ;;  %vm214_vm0 = vcmask 1043456  }
  0x11   : > { %428 = vset.pattern.permute.xlu1 %v453_v0  ;;  %427 = vset.pattern.permute.xlu0 %v453_v0  ;;  %s383_s26 = sshll.u32 %s583_s21, 2  ;;  %v174_v5 = vld [vmem:[%s576_s2 + $0x8] sm:$0xff]  ;;  %v168_v6 = vld [vmem:[%s575_s1] sm:$0xff]  ;;  %vm201_vm1 = vcmask 31744   ;;  %v170_v7 = vld [vmem:[%s575_s1 + $0x10] sm:$0xff]  ;;  %s158_s21 = sand.u32 1, %s443_s12  }
  0x12   : > { %189 = vperm.xlu1 %428, %v175_v1   ;;  %179 = vperm.xlu0 %427, %v173_v2   ;;  %s165_s29 = scalar_lea.vmem %s574_s0, %s383_s26  ;;  %v169_v10 = vld [vmem:[%s575_s1 + $0x8] sm:$0xff]  ;;  %v171_v11 = vld [vmem:[%s575_s1 + $0x18] sm:$0xff]  ;;  %s381_s22 = sshll.u32 %s158_s21, 6 }
  0x13   : > { %v172_v3 = vld [vmem:[%s165_s29] sm:$0xff]  ;;  %s540_s23 = scalar_lea.vmem [#allocation2], %s381_s22  ;;  %s399_s12 = sshll.u32 (%p499_p4), %s487_s15, 4 }
  0x14   : > { %198 = vst [vmem:[#allocation1] ss:$2 sm:$0xff] %v172_v3  ;;  %s294_s26 = scalar_lea.vmem (%p499_p4), %s577_s3, %s399_s12 }
  0x1a   : > { %194 = vperm.xlu1 %428, %v176_v4   ;;  %184 = vperm.xlu0 %427, %v174_v5  }
  0x1b   : > { %v199_v8 = vld.sshfl [vmem:[#allocation1] sm:$0xff pattern:$0x75316420]  ;;  %v200_v9 = vld.sshfl [vmem:[#allocation1 + $0x8] sm:$0xff pattern:$0x75316420] }
  0x1c   : > { %384 = vmatpush.msk.msra.mxu0 %vm214_vm0, %v199_v8  ;;  %400 = vmatpush.msk.msra.mxu2 %vm214_vm0, %v199_v8 }
  0x1d   : > { %389 = vmatpush.msk.msra.mxu1 %vm214_vm0, %v200_v9  ;;  %401 = vmatpush.msk.msra.mxu3 %vm214_vm0, %v200_v9 }
  0x1e   : > { %385 = vmatmul.msk.f32.vlgmr.msra.gmra.mxu0 %vm201_vm1, %v168_v6  ;;  %387 = vmatmul.msk.f32.vlgmr.msra.gmra.mxu2 %vm201_vm1, %v170_v7 }
  0x1f   : > { %390 = vmatmul.msk.f32.vlgmr.msra.gmra.mxu1 %vm201_vm1, %v168_v6  ;;  %392 = vmatmul.msk.f32.vlgmr.msra.gmra.mxu3 %vm201_vm1, %v170_v7 }
  0x26   : > { %386 = vmatmul.msk.f32.gmra.mxu0 %vm201_vm1, %v169_v10  ;;  %388 = vmatmul.msk.f32.gmra.mxu2 %vm201_vm1, %v171_v11 }
  0x27   : > { %391 = vmatmul.msk.f32.gmra.mxu1 %vm201_vm1, %v169_v10  ;;  %393 = vmatmul.msk.f32.gmra.mxu3 %vm201_vm1, %v171_v11 }
  0x84   : > { %v180_v12 = vpop.permute.xlu0 %179  ;;  %v190_v17 = vpop.permute.xlu1 %189 }
  0x8c   : > { %v185_v21 = vpop.permute.xlu0 %184  ;;  %v195_v27 = vpop.permute.xlu1 %194 }
  0x9b   : > { %v236_v13 = vpop.f32.mrf.mxu0 }
  0x9c   : > { %v237_v14 = vadd.f32 %v236_v13, %v180_v12  ;;  %v265_v15 = vpop.f32.mrf.mxu1 }
  0x9d   : > { %v266_v16 = vadd.f32 %v265_v15, %v180_v12 }
  0x9e   : > { %277 = vst [vmem:[%s540_s23] sm:$0xff] %v237_v14 }
  0x9f   : > { %278 = vst [vmem:[%s540_s23 + $0x8] sm:$0xff] %v266_v16 }
  0xa1   : > { %v242_v18 = vpop.f32.mrf.mxu2 }
  0xa2   : > { %v243_v19 = vadd.f32 %v242_v18, %v190_v17  ;;  %v271_v20 = vpop.f32.mrf.mxu3 }
  0xa3   : > { %v272_v22 = vadd.f32 %v271_v20, %v190_v17  ;;  %v239_v23 = vpop.f32.mrf.mxu0 }
  0xa4   : > { %281 = vst [vmem:[%s540_s23 + $0x20] sm:$0xff] %v243_v19  ;;  %v240_v24 = vadd.f32 %v239_v23, %v185_v21  ;;  %v268_v25 = vpop.f32.mrf.mxu1 }
  0xa5   : > { %282 = vst [vmem:[%s540_s23 + $0x28] sm:$0xff] %v272_v22  ;;  %v269_v26 = vadd.f32 %v268_v25, %v185_v21  ;;  %v307_v32 = vld [vmem:[%s540_s23] sm:$0xff] (%p499_p4) }
  0xa6   : > { %279 = vst [vmem:[%s540_s23 + $0x10] sm:$0xff] %v240_v24  ;;  %v309_v33 = vld [vmem:[%s540_s23 + $0x8] sm:$0xff] (%p499_p4) }
  0xa7   : > { %280 = vst [vmem:[%s540_s23 + $0x18] sm:$0xff] %v269_v26 }
  0xa8   : > { %308 = vst [vmem:[%s294_s26] sm:$0xff] (%p499_p4), %v307_v32 }
  0xa9   : > { %v245_v28 = vpop.f32.mrf.mxu2  ;;  %291 = sbr.rel (!%p499_p4) target bundleno = 182 (0xb6), region = 36  ;;  %310 = vst [vmem:[%s294_s26 + $0x8] sm:$0xff] (%p499_p4), %v309_v33 }
  0xaa   : > { %v246_v29 = vadd.f32 %v245_v28, %v195_v27  ;;  %v274_v30 = vpop.f32.mrf.mxu3 }
  0xab   : > { %v275_v31 = vadd.f32 %v274_v30, %v195_v27  ;;  %v315_v36 = vld [vmem:[%s540_s23 + $0x20] sm:$0xff] (%p499_p4) }
  0xac   : > { %283 = vst [vmem:[%s540_s23 + $0x30] sm:$0xff] %v246_v29  ;;  %v317_v37 = vld [vmem:[%s540_s23 + $0x28] sm:$0xff] (%p499_p4) }
  0xad   : > { %284 = vst [vmem:[%s540_s23 + $0x38] sm:$0xff] %v275_v31  ;;  %v311_v34 = vld [vmem:[%s540_s23 + $0x10] sm:$0xff] (%p499_p4) }
  0xae   : > { %v313_v35 = vld [vmem:[%s540_s23 + $0x18] sm:$0xff]  ;;  %312 = vst [vmem:[%s294_s26 + $0x20] sm:$0xff] %v311_v34 }
  0xaf   : > { %314 = vst [vmem:[%s294_s26 + $0x28] sm:$0xff] %v313_v35 }
  0xb0   : > { %316 = vst [vmem:[%s294_s26 + $0x40] sm:$0xff] %v315_v36 }
  0xb1   : > { %318 = vst [vmem:[%s294_s26 + $0x48] sm:$0xff] %v317_v37 }
  0xb3   : > { %v319_v38 = vld [vmem:[%s540_s23 + $0x30] sm:$0xff] }
  0xb4   : > { %v321_v39 = vld [vmem:[%s540_s23 + $0x38] sm:$0xff]  ;;  %320 = vst [vmem:[%s294_s26 + $0x60] sm:$0xff] %v319_v38 }
  0xb5   : > { %322 = vst [vmem:[%s294_s26 + $0x68] sm:$0xff] %v321_v39 }
  0xb6 PF: > { %p10_p8 = scmp.ge.s32.totalorder %s489_s16, 4   ;;  %s579_s12 = smov %s447_s13 }
  0xb7   : > { %s580_s13 = smov %s497_s19  ;;  %s581_s14 = smov %s489_s16 }
  0xb8   :  { %12 = sbr.rel (!%p10_p8) target bundleno = 2 (0x2), region = 85 }

// kernel: fno_block2d_forward.11
= control target key start
LH: loop header
LB: loop body
LE: loop exit
PB: predicated region body
PF: predicated region fallthrough
CT: control target
= control target key end

     0   :  { %s2040_s21 = smov 0   ;;  %s2625_s0 = inlined_call_operand.vmem [shape: f32[32,2,32], index: 0, kind: input, shape index: {}]   ;;  %s2626_s1 = inlined_call_operand.vmem [shape: f32[32,2,32], index: 1, kind: input, shape index: {}]   ;;  %s2627_s2 = inlined_call_operand.vmem [shape: f32[32,32,32], index: 2, kind: input, shape index: {}]   ;;  %s2628_s3 = inlined_call_operand.vmem [shape: f32[32,32,32], index: 3, kind: input, shape index: {}]   ;;  %s2629_s4 = inlined_call_operand.vmem [shape: f32[32,32,32], index: 4, kind: input, shape index: {}]   ;;  %s2630_s5 = inlined_call_operand.vmem [shape: f32[32,2,32], index: 5, kind: output, shape index: {0}]   ;;  %s2631_s6 = inlined_call_operand.vmem [shape: f32[32,2,32], index: 6, kind: output, shape index: {1}]  }
   0x1 LB: > { %s1914_s22 = sadd.s32 4294967295, %s2003_s21   ;;  %p1918_p0 = scmp.ge.s32.totalorder %s2003_s21, 1  ;;  %s2003_s21 = sphi %s2040_s21, %s17_s21  }
   0x2   : > { %p263_p1 = scmp.lt.s32.totalorder %s2003_s21, 3 }
   0x4   : > { %p264_p2 = pnand %p1918_p0, %p263_p1 }
   0x5   : > { %s1919_s23 = sshll.u32 (!%p264_p2), %s1914_s22, 4 }
   0x6   : > { %267 = sbr.rel (%p264_p2) target bundleno = 271 (0x10f), region = 40  ;;  %p322_p3 = scmp.lt.s32.totalorder (!%p264_p2), %s1919_s23, 31 }
   0xb   : > { %s2633_s23 = smov (!%p322_p3, %s1919_s23), 31  ;;  %vm478_vm0 = vcmask 261120   ;;  %vm1727_vm1 = vcmask 254976  }
   0xc   : > { %s2048_s24 = sshll.u32 %s2633_s23, 5  ;;  %s2056_s28 = sshll.u32 %s2633_s23, 1 }
   0xd   : > { %s2054_s27 = scalar_lea.vmem %s2627_s2, %s2048_s24  ;;  %s2071_s7 = scalar_lea.vmem %s2625_s0, %s2056_s28 }
   0xe   : > { %v417_v0 = vld [vmem:[%s2054_s27 + $0x18] sm:$0xff]  ;;  %v416_v4 = vld [vmem:[%s2054_s27 + $0x10] sm:$0xff]  ;;  %v415_v8 = vld [vmem:[%s2054_s27 + $0x8] sm:$0xff]  ;;  %s2077_s10 = scalar_lea.vmem %s2626_s1, %s2056_s28  ;;  %s2274_s13 = scalar_lea.vmem %s2628_s3, %s2048_s24 }
   0xf   : > { %v421_v1 = vld [vmem:[%s2054_s27 + $0x38] sm:$0xff]  ;;  %494 = vmatpush.msra.mxu0 %v417_v0  ;;  %v420_v5 = vld [vmem:[%s2054_s27 + $0x30] sm:$0xff]  ;;  %v419_v9 = vld [vmem:[%s2054_s27 + $0x28] sm:$0xff]  ;;  %s2376_s16 = scalar_lea.vmem %s2629_s4, %s2048_s24  ;;  %s2518_s19 = scalar_lea.vmem %s2630_s5, %s2056_s28 }
  0x10   : > { %v425_v2 = vld [vmem:[%s2054_s27 + $0x58] sm:$0xff]  ;;  %517 = vmatpush.msra.mxu1 %v421_v1  ;;  %v424_v6 = vld [vmem:[%s2054_s27 + $0x50] sm:$0xff]  ;;  %v423_v10 = vld [vmem:[%s2054_s27 + $0x48] sm:$0xff]  ;;  %s2570_s23 = scalar_lea.vmem %s2631_s6, %s2056_s28 }
  0x11   : > { %v429_v3 = vld [vmem:[%s2054_s27 + $0x78] sm:$0xff]  ;;  %540 = vmatpush.msra.mxu2 %v425_v2  ;;  %v428_v7 = vld [vmem:[%s2054_s27 + $0x70] sm:$0xff]  ;;  %495 = vmatpush.msra.mxu0 %v416_v4  ;;  %v427_v11 = vld [vmem:[%s2054_s27 + $0x68] sm:$0xff] }
  0x12   : > { %563 = vmatpush.msra.mxu3 %v429_v3  ;;  %518 = vmatpush.msra.mxu1 %v420_v5  ;;  %v414_v12 = vld [vmem:[%s2054_s27] sm:$0xff]  ;;  %v441_v28 = vld [vmem:[%s2054_s27 + $0xd8] sm:$0xff]  ;;  %v440_v32 = vld [vmem:[%s2054_s27 + $0xd0] sm:$0xff] }
  0x13   : > { %541 = vmatpush.msra.mxu2 %v424_v6  ;;  %v418_v13 = vld [vmem:[%s2054_s27 + $0x20] sm:$0xff]  ;;  %496 = vmatpush.msra.mxu0 %v415_v8  ;;  %v445_v29 = vld [vmem:[%s2054_s27 + $0xf8] sm:$0xff]  ;;  %v444_v33 = vld [vmem:[%s2054_s27 + $0xf0] sm:$0xff] }
  0x14   : > { %564 = vmatpush.msra.mxu3 %v428_v7  ;;  %v422_v14 = vld [vmem:[%s2054_s27 + $0x40] sm:$0xff]  ;;  %519 = vmatpush.msra.mxu1 %v419_v9  ;;  %v433_v30 = vld [vmem:[%s2054_s27 + $0x98] sm:$0xff]  ;;  %v432_v34 = vld [vmem:[%s2054_s27 + $0x90] sm:$0xff] }
  0x15   : > { %v426_v15 = vld [vmem:[%s2054_s27 + $0x60] sm:$0xff]  ;;  %542 = vmatpush.msra.mxu2 %v423_v10  ;;  %497 = vmatpush.msra.mxu0 %v414_v12  ;;  %v437_v31 = vld [vmem:[%s2054_s27 + $0xb8] sm:$0xff]  ;;  %v436_v35 = vld [vmem:[%s2054_s27 + $0xb0] sm:$0xff] }
  0x16   : > { %v2087_v16 = vld [vmem:[%s2071_s7] sm:$0x3]  ;;  %565 = vmatpush.msra.mxu3 %v427_v11  ;;  %v2095_v19 = vld [vmem:[%s2071_s7 + $0x2] sm:$0x3]  ;;  %v2101_v21 = vld [vmem:[%s2071_s7 + $0x4] sm:$0x3]  ;;  %520 = vmatpush.msra.mxu1 %v418_v13 }
  0x17   : > { %v2090_v17 = vld [vmem:[%s2077_s10] sm:$0x3]  ;;  %v2098_v20 = vld [vmem:[%s2077_s10 + $0x2] sm:$0x3]  ;;  %v2106_v23 = vld [vmem:[%s2077_s10 + $0x4] sm:$0x3]  ;;  %543 = vmatpush.msra.mxu2 %v422_v14  ;;  %586 = vmatpush.msrb.mxu0 %v433_v30 }
  0x18   : > { %v398_v18 = vadd.f32 %v2090_v17, %v2087_v16  ;;  %v399_v22 = vadd.f32 %v2098_v20, %v2095_v19  ;;  %v2109_v24 = vld [vmem:[%s2071_s7 + $0x6] sm:$0x3]  ;;  %566 = vmatpush.msra.mxu3 %v426_v15  ;;  %v400_v26 = vadd.f32 %v2106_v23, %v2101_v21  ;;  %v439_v36 = vld [vmem:[%s2054_s27 + $0xc8] sm:$0xff]  ;;  %609 = vmatpush.msrb.mxu1 %v437_v31  ;;  %v457_v56 = vld [vmem:[%s2054_s27 + $0x158] sm:$0xff] }
  0x19   : > { %v2112_v25 = vld [vmem:[%s2077_s10 + $0x6] sm:$0x3]  ;;  %632 = vmatpush.msrb.mxu2 %v441_v28  ;;  %v443_v37 = vld [vmem:[%s2054_s27 + $0xe8] sm:$0xff]  ;;  %587 = vmatpush.msrb.mxu0 %v432_v34  ;;  %v461_v57 = vld [vmem:[%s2054_s27 + $0x178] sm:$0xff] }
  0x1a   : > { %v401_v27 = vadd.f32 %v2112_v25, %v2109_v24  ;;  %1936 = vmatmul.msk.f32.vlgmr.msra.gmra.mxu0 %vm478_vm0, %v398_v18  ;;  %1937 = vmatmul.msk.f32.vlgmr.msra.gmra.mxu1 %vm478_vm0, %v399_v22  ;;  %v431_v38 = vld [vmem:[%s2054_s27 + $0x88] sm:$0xff]  ;;  %v438_v40 = vld [vmem:[%s2054_s27 + $0xc0] sm:$0xff]  ;;  %v449_v58 = vld [vmem:[%s2054_s27 + $0x118] sm:$0xff] }
  0x1b   : > { %1938 = vmatmul.msk.f32.vlgmr.msra.gmra.mxu2 %vm478_vm0, %v400_v26  ;;  %655 = vmatpush.msrb.mxu3 %v445_v29  ;;  %v435_v39 = vld [vmem:[%s2054_s27 + $0xa8] sm:$0xff]  ;;  %v442_v41 = vld [vmem:[%s2054_s27 + $0xe0] sm:$0xff]  ;;  %v453_v59 = vld [vmem:[%s2054_s27 + $0x138] sm:$0xff] }
  0x1c   : > { %1939 = vmatmul.msk.f32.vlgmr.msra.gmra.mxu3 %vm478_vm0, %v401_v27  ;;  %633 = vmatpush.msrb.mxu2 %v440_v32  ;;  %v430_v42 = vld [vmem:[%s2054_s27 + $0x80] sm:$0xff]  ;;  %v2139_v44 = vld [vmem:[%s2071_s7 + $0x8] sm:$0x3]  ;;  %v2145_v46 = vld [vmem:[%s2071_s7 + $0xa] sm:$0x3] }
  0x1d   : > { %656 = vmatpush.msrb.mxu3 %v444_v33  ;;  %v434_v43 = vld [vmem:[%s2054_s27 + $0xa0] sm:$0xff]  ;;  %v2142_v45 = vld [vmem:[%s2077_s10 + $0x8] sm:$0x3]  ;;  %610 = vmatpush.msrb.mxu1 %v436_v35  ;;  %v2148_v47 = vld [vmem:[%s2077_s10 + $0xa] sm:$0x3] }
  0x1e   : > { %v2151_v48 = vld [vmem:[%s2071_s7 + $0xc] sm:$0x3]  ;;  %634 = vmatpush.msrb.mxu2 %v439_v36  ;;  %v402_v49 = vadd.f32 %v2142_v45, %v2139_v44  ;;  %v403_v50 = vadd.f32 %v2148_v47, %v2145_v46  ;;  %v2161_v52 = vld [vmem:[%s2071_s7 + $0xe] sm:$0x3]  ;;  %588 = vmatpush.msrb.mxu0 %v431_v38  ;;  %v456_v60 = vld [vmem:[%s2054_s27 + $0x150] sm:$0xff] }
  0x1f   : > { %657 = vmatpush.msrb.mxu3 %v443_v37  ;;  %v2158_v51 = vld [vmem:[%s2077_s10 + $0xc] sm:$0x3]  ;;  %v2164_v53 = vld [vmem:[%s2077_s10 + $0xe] sm:$0x3]  ;;  %611 = vmatpush.msrb.mxu1 %v435_v39  ;;  %v460_v61 = vld [vmem:[%s2054_s27 + $0x170] sm:$0xff] }
  0x20   : > { %v404_v54 = vadd.f32 %v2158_v51, %v2151_v48  ;;  %v405_v55 = vadd.f32 %v2164_v53, %v2161_v52  ;;  %635 = vmatpush.msrb.mxu2 %v438_v40  ;;  %589 = vmatpush.msrb.mxu0 %v430_v42  ;;  %v448_v62 = vld [vmem:[%s2054_s27 + $0x110] sm:$0xff]  ;;  %v455_v0 = vld [vmem:[%s2054_s27 + $0x148] sm:$0xff]  ;;  %v454_v12 = vld [vmem:[%s2054_s27 + $0x140] sm:$0xff] }
  0x21   : > { %658 = vmatpush.msrb.mxu3 %v442_v41  ;;  %612 = vmatpush.msrb.mxu1 %v434_v43  ;;  %v452_v63 = vld [vmem:[%s2054_s27 + $0x130] sm:$0xff]  ;;  %v459_v1 = vld [vmem:[%s2054_s27 + $0x168] sm:$0xff]  ;;  %v458_v13 = vld [vmem:[%s2054_s27 + $0x160] sm:$0xff] }
  0x22   : > { %1940 = vmatmul.msk.f32.vlgmr.msrb.gmra.mxu0 %vm478_vm0, %v402_v49  ;;  %1941 = vmatmul.msk.f32.vlgmr.msrb.gmra.mxu1 %vm478_vm0, %v403_v50  ;;  %v447_v2 = vld [vmem:[%s2054_s27 + $0x108] sm:$0xff]  ;;  %v2187_v4 = vld [vmem:[%s2071_s7 + $0x10] sm:$0x3]  ;;  %v2193_v6 = vld [vmem:[%s2071_s7 + $0x12] sm:$0x3] }
  0x23   : > { %1942 = vmatmul.msk.f32.vlgmr.msrb.gmra.mxu2 %vm478_vm0, %v404_v54  ;;  %747 = vmatpush.msra.mxu3 %v461_v57  ;;  %v451_v3 = vld [vmem:[%s2054_s27 + $0x128] sm:$0xff]  ;;  %v2190_v5 = vld [vmem:[%s2077_s10 + $0x10] sm:$0x3]  ;;  %v2196_v7 = vld [vmem:[%s2077_s10 + $0x12] sm:$0x3] }
  0x24   : > { %1943 = vmatmul.msk.f32.vlgmr.msrb.gmra.mxu3 %vm478_vm0, %v405_v55  ;;  %724 = vmatpush.msra.mxu2 %v457_v56  ;;  %v2199_v8 = vld [vmem:[%s2071_s7 + $0x14] sm:$0x3]  ;;  %v2205_v10 = vld [vmem:[%s2071_s7 + $0x16] sm:$0x3]  ;;  %v446_v14 = vld [vmem:[%s2054_s27 + $0x100] sm:$0xff]  ;;  %v406_v18 = vadd.f32 %v2190_v5, %v2187_v4  ;;  %v407_v22 = vadd.f32 %v2196_v7, %v2193_v6 }
  0x25   : > { %678 = vmatpush.msra.mxu0 %v449_v58  ;;  %701 = vmatpush.msra.mxu1 %v453_v59  ;;  %v2202_v9 = vld [vmem:[%s2077_s10 + $0x14] sm:$0x3]  ;;  %v2208_v11 = vld [vmem:[%s2077_s10 + $0x16] sm:$0x3]  ;;  %v450_v15 = vld [vmem:[%s2054_s27 + $0x120] sm:$0xff] }
  0x26   : > { %725 = vmatpush.msra.mxu2 %v456_v60  ;;  %748 = vmatpush.msra.mxu3 %v460_v61  ;;  %v408_v26 = vadd.f32 %v2202_v9, %v2199_v8  ;;  %v409_v27 = vadd.f32 %v2208_v11, %v2205_v10  ;;  %v473_v28 = vld [vmem:[%s2054_s27 + $0x1d8] sm:$0xff]  ;;  %v472_v32 = vld [vmem:[%s2054_s27 + $0x1d0] sm:$0xff]  ;;  %v471_v36 = vld [vmem:[%s2054_s27 + $0x1c8] sm:$0xff] }
  0x27   : > { %679 = vmatpush.msra.mxu0 %v448_v62  ;;  %702 = vmatpush.msra.mxu1 %v452_v63  ;;  %v477_v29 = vld [vmem:[%s2054_s27 + $0x1f8] sm:$0xff]  ;;  %v476_v33 = vld [vmem:[%s2054_s27 + $0x1f0] sm:$0xff]  ;;  %v475_v37 = vld [vmem:[%s2054_s27 + $0x1e8] sm:$0xff] }
  0x28   : > { %726 = vmatpush.msra.mxu2 %v455_v0  ;;  %749 = vmatpush.msra.mxu3 %v459_v1  ;;  %v465_v30 = vld [vmem:[%s2054_s27 + $0x198] sm:$0xff]  ;;  %v464_v34 = vld [vmem:[%s2054_s27 + $0x190] sm:$0xff]  ;;  %v463_v38 = vld [vmem:[%s2054_s27 + $0x188] sm:$0xff] }
  0x29   : > { %680 = vmatpush.msra.mxu0 %v447_v2  ;;  %703 = vmatpush.msra.mxu1 %v451_v3  ;;  %v469_v31 = vld [vmem:[%s2054_s27 + $0x1b8] sm:$0xff]  ;;  %v468_v35 = vld [vmem:[%s2054_s27 + $0x1b0] sm:$0xff]  ;;  %v467_v39 = vld [vmem:[%s2054_s27 + $0x1a8] sm:$0xff] }
  0x2a   : > { %727 = vmatpush.msra.mxu2 %v454_v12  ;;  %750 = vmatpush.msra.mxu3 %v458_v13  ;;  %v2239_v40 = vld [vmem:[%s2071_s7 + $0x18] sm:$0x3]  ;;  %v2245_v42 = vld [vmem:[%s2071_s7 + $0x1a] sm:$0x3]  ;;  %v2251_v49 = vld [vmem:[%s2071_s7 + $0x1c] sm:$0x3] }
  0x2b   : > { %681 = vmatpush.msra.mxu0 %v446_v14  ;;  %704 = vmatpush.msra.mxu1 %v450_v15  ;;  %v2242_v41 = vld [vmem:[%s2077_s10 + $0x18] sm:$0x3]  ;;  %v2248_v43 = vld [vmem:[%s2077_s10 + $0x1a] sm:$0x3]  ;;  %v2254_v50 = vld [vmem:[%s2077_s10 + $0x1c] sm:$0x3] }
  0x2c   : > { %1944 = vmatmul.msk.f32.vlgmr.msra.gmra.mxu0 %vm478_vm0, %v406_v18  ;;  %1945 = vmatmul.msk.f32.vlgmr.msra.gmra.mxu1 %vm478_vm0, %v407_v22  ;;  %v2257_v54 = vld [vmem:[%s2071_s7 + $0x1e] sm:$0x3]  ;;  %v470_v56 = vld [vmem:[%s2054_s27 + $0x1c0] sm:$0xff]  ;;  %v410_v60 = vadd.f32 %v2242_v41, %v2239_v40  ;;  %v411_v61 = vadd.f32 %v2248_v43, %v2245_v42  ;;  %v412_v62 = vadd.f32 %v2254_v50, %v2251_v49  ;;  %v857_v12 = vld [vmem:[%s2274_s13 + $0x50] sm:$0xff] }
  0x2d   : > { %1946 = vmatmul.msk.f32.vlgmr.msra.gmra.mxu2 %vm478_vm0, %v408_v26  ;;  %1947 = vmatmul.msk.f32.vlgmr.msra.gmra.mxu3 %vm478_vm0, %v409_v27  ;;  %v2260_v55 = vld [vmem:[%s2077_s10 + $0x1e] sm:$0x3]  ;;  %v474_v57 = vld [vmem:[%s2054_s27 + $0x1e0] sm:$0xff]  ;;  %v861_v13 = vld [vmem:[%s2274_s13 + $0x70] sm:$0xff] }
  0x2e   : > { %816 = vmatpush.msrb.mxu2 %v473_v28  ;;  %839 = vmatpush.msrb.mxu3 %v477_v29  ;;  %v462_v58 = vld [vmem:[%s2054_s27 + $0x180] sm:$0xff]  ;;  %v413_v63 = vadd.f32 %v2260_v55, %v2257_v54  ;;  %v858_v0 = vld [vmem:[%s2274_s13 + $0x58] sm:$0xff]  ;;  %v849_v14 = vld [vmem:[%s2274_s13 + $0x10] sm:$0xff] }
  0x2f   : > { %770 = vmatpush.msrb.mxu0 %v465_v30  ;;  %793 = vmatpush.msrb.mxu1 %v469_v31  ;;  %v466_v59 = vld [vmem:[%s2054_s27 + $0x1a0] sm:$0xff]  ;;  %v862_v1 = vld [vmem:[%s2274_s13 + $0x78] sm:$0xff]  ;;  %v853_v15 = vld [vmem:[%s2274_s13 + $0x30] sm:$0xff] }
  0x30   : > { %817 = vmatpush.msrb.mxu2 %v472_v32  ;;  %840 = vmatpush.msrb.mxu3 %v476_v33  ;;  %v850_v2 = vld [vmem:[%s2274_s13 + $0x18] sm:$0xff]  ;;  %v856_v18 = vld [vmem:[%s2274_s13 + $0x48] sm:$0xff]  ;;  %v855_v28 = vld [vmem:[%s2274_s13 + $0x40] sm:$0xff] }
  0x31   : > { %771 = vmatpush.msrb.mxu0 %v464_v34  ;;  %794 = vmatpush.msrb.mxu1 %v468_v35  ;;  %v854_v3 = vld [vmem:[%s2274_s13 + $0x38] sm:$0xff]  ;;  %v860_v22 = vld [vmem:[%s2274_s13 + $0x68] sm:$0xff]  ;;  %v859_v29 = vld [vmem:[%s2274_s13 + $0x60] sm:$0xff] }
  0x32   : > { %818 = vmatpush.msrb.mxu2 %v471_v36  ;;  %841 = vmatpush.msrb.mxu3 %v475_v37  ;;  %v848_v26 = vld [vmem:[%s2274_s13 + $0x8] sm:$0xff]  ;;  %v847_v30 = vld [vmem:[%s2274_s13] sm:$0xff]  ;;  %v874_v32 = vld [vmem:[%s2274_s13 + $0xd8] sm:$0xff] }
  0x33   : > { %772 = vmatpush.msrb.mxu0 %v463_v38  ;;  %795 = vmatpush.msrb.mxu1 %v467_v39  ;;  %v852_v27 = vld [vmem:[%s2274_s13 + $0x28] sm:$0xff]  ;;  %v851_v31 = vld [vmem:[%s2274_s13 + $0x20] sm:$0xff]  ;;  %v878_v33 = vld [vmem:[%s2274_s13 + $0xf8] sm:$0xff] }
  0x34   : > { %819 = vmatpush.msrb.mxu2 %v470_v56  ;;  %842 = vmatpush.msrb.mxu3 %v474_v57  ;;  %v866_v34 = vld [vmem:[%s2274_s13 + $0x98] sm:$0xff]  ;;  %v873_v36 = vld [vmem:[%s2274_s13 + $0xd0] sm:$0xff]  ;;  %v876_v39 = vld [vmem:[%s2274_s13 + $0xe8] sm:$0xff] }
  0x35   : > { %773 = vmatpush.msrb.mxu0 %v462_v58  ;;  %796 = vmatpush.msrb.mxu1 %v466_v59  ;;  %v870_v35 = vld [vmem:[%s2274_s13 + $0xb8] sm:$0xff]  ;;  %v877_v37 = vld [vmem:[%s2274_s13 + $0xf0] sm:$0xff]  ;;  %v868_v56 = vld [vmem:[%s2274_s13 + $0xa8] sm:$0xff] }
  0x36   : > { %1948 = vmatmul.msk.f32.vlgmr.msrb.gmra.mxu0 %vm478_vm0, %v410_v60  ;;  %1949 = vmatmul.msk.f32.vlgmr.msrb.gmra.mxu1 %vm478_vm0, %v411_v61  ;;  %v869_v38 = vld [vmem:[%s2274_s13 + $0xb0] sm:$0xff]  ;;  %v875_v57 = vld [vmem:[%s2274_s13 + $0xe0] sm:$0xff]  ;;  %v890_v60 = vld [vmem:[%s2274_s13 + $0x158] sm:$0xff] }
  0x37   : > { %1950 = vmatmul.msk.f32.vlgmr.msrb.gmra.mxu2 %vm478_vm0, %v412_v62  ;;  %1951 = vmatmul.msk.f32.vlgmr.msrb.gmra.mxu3 %vm478_vm0, %v413_v63  ;;  %v863_v58 = vld [vmem:[%s2274_s13 + $0x80] sm:$0xff]  ;;  %v894_v61 = vld [vmem:[%s2274_s13 + $0x178] sm:$0xff] }
  0x38   : > { %972 = vmatpush.msra.mxu2 %v858_v0  ;;  %995 = vmatpush.msra.mxu3 %v862_v1  ;;  %v867_v59 = vld [vmem:[%s2274_s13 + $0xa0] sm:$0xff]  ;;  %v882_v62 = vld [vmem:[%s2274_s13 + $0x118] sm:$0xff]  ;;  %v889_v0 = vld [vmem:[%s2274_s13 + $0x150] sm:$0xff] }
  0x39   : > { %926 = vmatpush.msra.mxu0 %v850_v2  ;;  %949 = vmatpush.msra.mxu1 %v854_v3  ;;  %v886_v63 = vld [vmem:[%s2274_s13 + $0x138] sm:$0xff]  ;;  %v893_v1 = vld [vmem:[%s2274_s13 + $0x170] sm:$0xff]  ;;  %v892_v3 = vld [vmem:[%s2274_s13 + $0x168] sm:$0xff] }
  0x3a   : > { %973 = vmatpush.msra.mxu2 %v857_v12  ;;  %996 = vmatpush.msra.mxu3 %v861_v13  ;;  %v885_v2 = vld [vmem:[%s2274_s13 + $0x130] sm:$0xff]  ;;  %v884_v12 = vld [vmem:[%s2274_s13 + $0x128] sm:$0xff]  ;;  %v891_v13 = vld [vmem:[%s2274_s13 + $0x160] sm:$0xff] }
  0x3b   : > { %927 = vmatpush.msra.mxu0 %v849_v14  ;;  %950 = vmatpush.msra.mxu1 %v853_v15  ;;  %v879_v14 = vld [vmem:[%s2274_s13 + $0x100] sm:$0xff] }
  0x3c   : > { %974 = vmatpush.msra.mxu2 %v856_v18  ;;  %997 = vmatpush.msra.mxu3 %v860_v22  ;;  %v883_v15 = vld [vmem:[%s2274_s13 + $0x120] sm:$0xff]  ;;  %v906_v18 = vld [vmem:[%s2274_s13 + $0x1d8] sm:$0xff] }
  0x3d   : > { %928 = vmatpush.msra.mxu0 %v848_v26  ;;  %951 = vmatpush.msra.mxu1 %v852_v27  ;;  %v910_v22 = vld [vmem:[%s2274_s13 + $0x1f8] sm:$0xff] }
  0x3e   : > { %975 = vmatpush.msra.mxu2 %v855_v28  ;;  %998 = vmatpush.msra.mxu3 %v859_v29  ;;  %v898_v26 = vld [vmem:[%s2274_s13 + $0x198] sm:$0xff]  ;;  %v905_v28 = vld [vmem:[%s2274_s13 + $0x1d0] sm:$0xff] }
  0x3f   : > { %929 = vmatpush.msra.mxu0 %v847_v30  ;;  %952 = vmatpush.msra.mxu1 %v851_v31  ;;  %v902_v27 = vld [vmem:[%s2274_s13 + $0x1b8] sm:$0xff]  ;;  %v909_v29 = vld [vmem:[%s2274_s13 + $0x1f0] sm:$0xff]  ;;  %v908_v31 = vld [vmem:[%s2274_s13 + $0x1e8] sm:$0xff] }
  0x40   : > { %1952 = vmatmul.msk.f32.vlgmr.msra.gmra.mxu0 %vm478_vm0, %v2090_v17  ;;  %1953 = vmatmul.msk.f32.vlgmr.msra.gmra.mxu1 %vm478_vm0, %v2098_v20  ;;  %v865_v17 = vld [vmem:[%s2274_s13 + $0x90] sm:$0xff]  ;;  %v872_v20 = vld [vmem:[%s2274_s13 + $0xc8] sm:$0xff] }
  0x41   : > { %1954 = vmatmul.msk.f32.vlgmr.msra.gmra.mxu2 %vm478_vm0, %v2106_v23  ;;  %1955 = vmatmul.msk.f32.vlgmr.msra.gmra.mxu3 %vm478_vm0, %v2112_v25  ;;  %v864_v23 = vld [vmem:[%s2274_s13 + $0x88] sm:$0xff]  ;;  %v871_v25 = vld [vmem:[%s2274_s13 + $0xc0] sm:$0xff]  ;;  %v901_v30 = vld [vmem:[%s2274_s13 + $0x1b0] sm:$0xff] }
  0x42   : > { %1064 = vmatpush.msrb.mxu2 %v874_v32  ;;  %1087 = vmatpush.msrb.mxu3 %v878_v33  ;;  %v900_v32 = vld [vmem:[%s2274_s13 + $0x1a8] sm:$0xff]  ;;  %v907_v33 = vld [vmem:[%s2274_s13 + $0x1e0] sm:$0xff] }
  0x43   : > { %1018 = vmatpush.msrb.mxu0 %v866_v34  ;;  %1041 = vmatpush.msrb.mxu1 %v870_v35  ;;  %v895_v34 = vld [vmem:[%s2274_s13 + $0x180] sm:$0xff] }
  0x44   : > { %1065 = vmatpush.msrb.mxu2 %v873_v36  ;;  %1088 = vmatpush.msrb.mxu3 %v877_v37  ;;  %v899_v35 = vld [vmem:[%s2274_s13 + $0x1a0] sm:$0xff]  ;;  %v1290_v36 = vld [vmem:[%s2376_s16 + $0x58] sm:$0xff] }
  0x45   : > { %1019 = vmatpush.msrb.mxu0 %v865_v17  ;;  %1042 = vmatpush.msrb.mxu1 %v869_v38  ;;  %v1294_v37 = vld [vmem:[%s2376_s16 + $0x78] sm:$0xff] }
  0x46   : > { %1066 = vmatpush.msrb.mxu2 %v872_v20  ;;  %1089 = vmatpush.msrb.mxu3 %v876_v39  ;;  %v1282_v17 = vld [vmem:[%s2376_s16 + $0x18] sm:$0xff]  ;;  %v1289_v20 = vld [vmem:[%s2376_s16 + $0x50] sm:$0xff] }
  0x47   : > { %1020 = vmatpush.msrb.mxu0 %v864_v23  ;;  %1043 = vmatpush.msrb.mxu1 %v868_v56  ;;  %v1286_v38 = vld [vmem:[%s2376_s16 + $0x38] sm:$0xff]  ;;  %v1293_v39 = vld [vmem:[%s2376_s16 + $0x70] sm:$0xff]  ;;  %v1292_v56 = vld [vmem:[%s2376_s16 + $0x68] sm:$0xff] }
  0x48   : > { %1067 = vmatpush.msrb.mxu2 %v871_v25  ;;  %1090 = vmatpush.msrb.mxu3 %v875_v57  ;;  %v1285_v23 = vld [vmem:[%s2376_s16 + $0x30] sm:$0xff]  ;;  %v1284_v25 = vld [vmem:[%s2376_s16 + $0x28] sm:$0xff]  ;;  %v1291_v57 = vld [vmem:[%s2376_s16 + $0x60] sm:$0xff] }
  0x49   : > { %1021 = vmatpush.msrb.mxu0 %v863_v58  ;;  %1044 = vmatpush.msrb.mxu1 %v867_v59  ;;  %v1279_v58 = vld [vmem:[%s2376_s16] sm:$0xff] }
  0x4a   : > { %1956 = vmatmul.msk.f32.vlgmr.msrb.gmra.mxu0 %vm478_vm0, %v2142_v45  ;;  %1957 = vmatmul.msk.f32.vlgmr.msrb.gmra.mxu1 %vm478_vm0, %v2148_v47  ;;  %v881_v45 = vld [vmem:[%s2274_s13 + $0x110] sm:$0xff]  ;;  %v888_v47 = vld [vmem:[%s2274_s13 + $0x148] sm:$0xff]  ;;  %v1283_v59 = vld [vmem:[%s2376_s16 + $0x20] sm:$0xff] }
  0x4b   : > { %1958 = vmatmul.msk.f32.vlgmr.msrb.gmra.mxu2 %vm478_vm0, %v2158_v51  ;;  %1959 = vmatmul.msk.f32.vlgmr.msrb.gmra.mxu3 %vm478_vm0, %v2164_v53  ;;  %v880_v51 = vld [vmem:[%s2274_s13 + $0x108] sm:$0xff]  ;;  %v887_v53 = vld [vmem:[%s2274_s13 + $0x140] sm:$0xff] }
  0x4c   : > { %1156 = vmatpush.msra.mxu2 %v890_v60  ;;  %1179 = vmatpush.msra.mxu3 %v894_v61  ;;  %v1306_v60 = vld [vmem:[%s2376_s16 + $0xd8] sm:$0xff] }
  0x4d   : > { %1110 = vmatpush.msra.mxu0 %v882_v62  ;;  %1133 = vmatpush.msra.mxu1 %v886_v63  ;;  %v1310_v61 = vld [vmem:[%s2376_s16 + $0xf8] sm:$0xff] }
  0x4e   : > { %1157 = vmatpush.msra.mxu2 %v889_v0  ;;  %1180 = vmatpush.msra.mxu3 %v893_v1  ;;  %v1298_v62 = vld [vmem:[%s2376_s16 + $0x98] sm:$0xff]  ;;  %v1305_v0 = vld [vmem:[%s2376_s16 + $0xd0] sm:$0xff] }
  0x4f   : > { %1111 = vmatpush.msra.mxu0 %v881_v45  ;;  %1134 = vmatpush.msra.mxu1 %v885_v2  ;;  %v1302_v63 = vld [vmem:[%s2376_s16 + $0xb8] sm:$0xff]  ;;  %v1309_v1 = vld [vmem:[%s2376_s16 + $0xf0] sm:$0xff]  ;;  %v1308_v2 = vld [vmem:[%s2376_s16 + $0xe8] sm:$0xff] }
  0x50   : > { %1158 = vmatpush.msra.mxu2 %v888_v47  ;;  %1181 = vmatpush.msra.mxu3 %v892_v3  ;;  %v1301_v45 = vld [vmem:[%s2376_s16 + $0xb0] sm:$0xff]  ;;  %v1300_v47 = vld [vmem:[%s2376_s16 + $0xa8] sm:$0xff]  ;;  %v1307_v3 = vld [vmem:[%s2376_s16 + $0xe0] sm:$0xff] }
  0x51   : > { %1112 = vmatpush.msra.mxu0 %v880_v51  ;;  %1135 = vmatpush.msra.mxu1 %v884_v12  ;;  %v1295_v51 = vld [vmem:[%s2376_s16 + $0x80] sm:$0xff] }
  0x52   : > { %1159 = vmatpush.msra.mxu2 %v887_v53  ;;  %1182 = vmatpush.msra.mxu3 %v891_v13  ;;  %v1299_v12 = vld [vmem:[%s2376_s16 + $0xa0] sm:$0xff]  ;;  %v1322_v53 = vld [vmem:[%s2376_s16 + $0x158] sm:$0xff] }
  0x53   : > { %1113 = vmatpush.msra.mxu0 %v879_v14  ;;  %1136 = vmatpush.msra.mxu1 %v883_v15  ;;  %v1326_v13 = vld [vmem:[%s2376_s16 + $0x178] sm:$0xff] }
  0x54   : > { %1960 = vmatmul.msk.f32.vlgmr.msra.gmra.mxu0 %vm478_vm0, %v2190_v5  ;;  %1961 = vmatmul.msk.f32.vlgmr.msra.gmra.mxu1 %vm478_vm0, %v2196_v7  ;;  %v897_v5 = vld [vmem:[%s2274_s13 + $0x190] sm:$0xff]  ;;  %v904_v7 = vld [vmem:[%s2274_s13 + $0x1c8] sm:$0xff]  ;;  %v1314_v14 = vld [vmem:[%s2376_s16 + $0x118] sm:$0xff] }
  0x55   : > { %1962 = vmatmul.msk.f32.vlgmr.msra.gmra.mxu2 %vm478_vm0, %v2202_v9  ;;  %1963 = vmatmul.msk.f32.vlgmr.msra.gmra.mxu3 %vm478_vm0, %v2208_v11  ;;  %v896_v9 = vld [vmem:[%s2274_s13 + $0x188] sm:$0xff]  ;;  %v903_v11 = vld [vmem:[%s2274_s13 + $0x1c0] sm:$0xff]  ;;  %v1318_v15 = vld [vmem:[%s2376_s16 + $0x138] sm:$0xff] }
  0x56   : > { %1248 = vmatpush.msrb.mxu2 %v906_v18  ;;  %1271 = vmatpush.msrb.mxu3 %v910_v22  ;;  %v1321_v18 = vld [vmem:[%s2376_s16 + $0x150] sm:$0xff] }
  0x57   : > { %1202 = vmatpush.msrb.mxu0 %v898_v26  ;;  %1225 = vmatpush.msrb.mxu1 %v902_v27  ;;  %v1325_v22 = vld [vmem:[%s2376_s16 + $0x170] sm:$0xff]  ;;  %v1324_v27 = vld [vmem:[%s2376_s16 + $0x168] sm:$0xff] }
  0x58   : > { %1249 = vmatpush.msrb.mxu2 %v905_v28  ;;  %1272 = vmatpush.msrb.mxu3 %v909_v29  ;;  %v1317_v26 = vld [vmem:[%s2376_s16 + $0x130] sm:$0xff]  ;;  %v1316_v28 = vld [vmem:[%s2376_s16 + $0x128] sm:$0xff]  ;;  %v1323_v29 = vld [vmem:[%s2376_s16 + $0x160] sm:$0xff] }
  0x59   : > { %1203 = vmatpush.msrb.mxu0 %v897_v5  ;;  %1226 = vmatpush.msrb.mxu1 %v901_v30  ;;  %v1311_v5 = vld [vmem:[%s2376_s16 + $0x100] sm:$0xff] }
  0x5a   : > { %1250 = vmatpush.msrb.mxu2 %v904_v7  ;;  %1273 = vmatpush.msrb.mxu3 %v908_v31  ;;  %v1315_v30 = vld [vmem:[%s2376_s16 + $0x120] sm:$0xff]  ;;  %v1338_v7 = vld [vmem:[%s2376_s16 + $0x1d8] sm:$0xff] }
  0x5b   : > { %1204 = vmatpush.msrb.mxu0 %v896_v9  ;;  %1227 = vmatpush.msrb.mxu1 %v900_v32  ;;  %v1342_v31 = vld [vmem:[%s2376_s16 + $0x1f8] sm:$0xff] }
  0x5c   : > { %1251 = vmatpush.msrb.mxu2 %v903_v11  ;;  %1274 = vmatpush.msrb.mxu3 %v907_v33  ;;  %v1330_v9 = vld [vmem:[%s2376_s16 + $0x198] sm:$0xff]  ;;  %v1337_v11 = vld [vmem:[%s2376_s16 + $0x1d0] sm:$0xff] }
  0x5d   : > { %1205 = vmatpush.msrb.mxu0 %v895_v34  ;;  %1228 = vmatpush.msrb.mxu1 %v899_v35  ;;  %v1334_v32 = vld [vmem:[%s2376_s16 + $0x1b8] sm:$0xff]  ;;  %v1341_v33 = vld [vmem:[%s2376_s16 + $0x1f0] sm:$0xff]  ;;  %v1340_v35 = vld [vmem:[%s2376_s16 + $0x1e8] sm:$0xff] }
  0x5e   : > { %1964 = vmatmul.msk.f32.vlgmr.msrb.gmra.mxu0 %vm478_vm0, %v2242_v41  ;;  %1965 = vmatmul.msk.f32.vlgmr.msrb.gmra.mxu1 %vm478_vm0, %v2248_v43  ;;  %v1281_v41 = vld [vmem:[%s2376_s16 + $0x10] sm:$0xff]  ;;  %v1288_v43 = vld [vmem:[%s2376_s16 + $0x48] sm:$0xff] }
  0x5f   : > { %1966 = vmatmul.msk.f32.vlgmr.msrb.gmra.mxu2 %vm478_vm0, %v2254_v50  ;;  %1967 = vmatmul.msk.f32.vlgmr.msrb.gmra.mxu3 %vm478_vm0, %v2260_v55  ;;  %v1280_v50 = vld [vmem:[%s2376_s16 + $0x8] sm:$0xff]  ;;  %v1287_v55 = vld [vmem:[%s2376_s16 + $0x40] sm:$0xff]  ;;  %v1333_v34 = vld [vmem:[%s2376_s16 + $0x1b0] sm:$0xff] }
  0x60   : > { %1404 = vmatpush.msra.mxu2 %v1290_v36  ;;  %1427 = vmatpush.msra.mxu3 %v1294_v37  ;;  %v1332_v36 = vld [vmem:[%s2376_s16 + $0x1a8] sm:$0xff]  ;;  %v1339_v37 = vld [vmem:[%s2376_s16 + $0x1e0] sm:$0xff] }
  0x61   : > { %1358 = vmatpush.msra.mxu0 %v1282_v17  ;;  %1381 = vmatpush.msra.mxu1 %v1286_v38  ;;  %v1327_v17 = vld [vmem:[%s2376_s16 + $0x180] sm:$0xff] }
  0x62   : > { %1405 = vmatpush.msra.mxu2 %v1289_v20  ;;  %1428 = vmatpush.msra.mxu3 %v1293_v39  ;;  %v1331_v38 = vld [vmem:[%s2376_s16 + $0x1a0] sm:$0xff] }
  0x63   : > { %1359 = vmatpush.msra.mxu0 %v1281_v41  ;;  %1382 = vmatpush.msra.mxu1 %v1285_v23 }
  0x64   : > { %1406 = vmatpush.msra.mxu2 %v1288_v43  ;;  %1429 = vmatpush.msra.mxu3 %v1292_v56 }
  0x65   : > { %1360 = vmatpush.msra.mxu0 %v1280_v50  ;;  %1383 = vmatpush.msra.mxu1 %v1284_v25 }
  0x66   : > { %1407 = vmatpush.msra.mxu2 %v1287_v55  ;;  %1430 = vmatpush.msra.mxu3 %v1291_v57 }
  0x67   : > { %1361 = vmatpush.msra.mxu0 %v1279_v58  ;;  %1384 = vmatpush.msra.mxu1 %v1283_v59 }
  0x68   : > { %1968 = vmatmul.msk.f32.vlgmr.msra.gmra.mxu0 %vm478_vm0, %v2087_v16  ;;  %1969 = vmatmul.msk.f32.vlgmr.msra.gmra.mxu1 %vm478_vm0, %v2095_v19  ;;  %v1297_v16 = vld [vmem:[%s2376_s16 + $0x90] sm:$0xff]  ;;  %v1304_v19 = vld [vmem:[%s2376_s16 + $0xc8] sm:$0xff] }
  0x69   : > { %1970 = vmatmul.msk.f32.vlgmr.msra.gmra.mxu2 %vm478_vm0, %v2101_v21  ;;  %1971 = vmatmul.msk.f32.vlgmr.msra.gmra.mxu3 %vm478_vm0, %v2109_v24  ;;  %v1296_v21 = vld [vmem:[%s2376_s16 + $0x88] sm:$0xff]  ;;  %v1303_v24 = vld [vmem:[%s2376_s16 + $0xc0] sm:$0xff] }
  0x6a   : > { %1496 = vmatpush.msrb.mxu2 %v1306_v60  ;;  %1519 = vmatpush.msrb.mxu3 %v1310_v61 }
  0x6b   : > { %1450 = vmatpush.msrb.mxu0 %v1298_v62  ;;  %1473 = vmatpush.msrb.mxu1 %v1302_v63 }
  0x6c   : > { %1497 = vmatpush.msrb.mxu2 %v1305_v0  ;;  %1520 = vmatpush.msrb.mxu3 %v1309_v1 }
  0x6d   : > { %1451 = vmatpush.msrb.mxu0 %v1297_v16  ;;  %1474 = vmatpush.msrb.mxu1 %v1301_v45 }
  0x6e   : > { %1498 = vmatpush.msrb.mxu2 %v1304_v19  ;;  %1521 = vmatpush.msrb.mxu3 %v1308_v2 }
  0x6f   : > { %1452 = vmatpush.msrb.mxu0 %v1296_v21  ;;  %1475 = vmatpush.msrb.mxu1 %v1300_v47 }
  0x70   : > { %1499 = vmatpush.msrb.mxu2 %v1303_v24  ;;  %1522 = vmatpush.msrb.mxu3 %v1307_v3 }
  0x71   : > { %1453 = vmatpush.msrb.mxu0 %v1295_v51  ;;  %1476 = vmatpush.msrb.mxu1 %v1299_v12 }
  0x72   : > { %1972 = vmatmul.msk.f32.vlgmr.msrb.gmra.mxu0 %vm478_vm0, %v2139_v44  ;;  %1973 = vmatmul.msk.f32.vlgmr.msrb.gmra.mxu1 %vm478_vm0, %v2145_v46  ;;  %v1313_v44 = vld [vmem:[%s2376_s16 + $0x110] sm:$0xff]  ;;  %v1320_v46 = vld [vmem:[%s2376_s16 + $0x148] sm:$0xff] }
  0x73   : > { %1974 = vmatmul.msk.f32.vlgmr.msrb.gmra.mxu2 %vm478_vm0, %v2151_v48  ;;  %1975 = vmatmul.msk.f32.vlgmr.msrb.gmra.mxu3 %vm478_vm0, %v2161_v52  ;;  %v1312_v48 = vld [vmem:[%s2376_s16 + $0x108] sm:$0xff]  ;;  %v1319_v52 = vld [vmem:[%s2376_s16 + $0x140] sm:$0xff] }
  0x74   : > { %1588 = vmatpush.msra.mxu2 %v1322_v53  ;;  %1611 = vmatpush.msra.mxu3 %v1326_v13 }
  0x75   : > { %1542 = vmatpush.msra.mxu0 %v1314_v14  ;;  %1565 = vmatpush.msra.mxu1 %v1318_v15 }
  0x76   : > { %1589 = vmatpush.msra.mxu2 %v1321_v18  ;;  %1612 = vmatpush.msra.mxu3 %v1325_v22 }
  0x77   : > { %1543 = vmatpush.msra.mxu0 %v1313_v44  ;;  %1566 = vmatpush.msra.mxu1 %v1317_v26 }
  0x78   : > { %1590 = vmatpush.msra.mxu2 %v1320_v46  ;;  %1613 = vmatpush.msra.mxu3 %v1324_v27 }
  0x79   : > { %1544 = vmatpush.msra.mxu0 %v1312_v48  ;;  %1567 = vmatpush.msra.mxu1 %v1316_v28 }
  0x7a   : > { %1591 = vmatpush.msra.mxu2 %v1319_v52  ;;  %1614 = vmatpush.msra.mxu3 %v1323_v29 }
  0x7b   : > { %1545 = vmatpush.msra.mxu0 %v1311_v5  ;;  %1568 = vmatpush.msra.mxu1 %v1315_v30 }
  0x7c   : > { %1976 = vmatmul.msk.f32.vlgmr.msra.gmra.mxu0 %vm478_vm0, %v2187_v4  ;;  %1977 = vmatmul.msk.f32.vlgmr.msra.gmra.mxu1 %vm478_vm0, %v2193_v6  ;;  %v1329_v4 = vld [vmem:[%s2376_s16 + $0x190] sm:$0xff]  ;;  %v1336_v6 = vld [vmem:[%s2376_s16 + $0x1c8] sm:$0xff] }
  0x7d   : > { %1978 = vmatmul.msk.f32.vlgmr.msra.gmra.mxu2 %vm478_vm0, %v2199_v8  ;;  %1979 = vmatmul.msk.f32.vlgmr.msra.gmra.mxu3 %vm478_vm0, %v2205_v10  ;;  %v1328_v8 = vld [vmem:[%s2376_s16 + $0x188] sm:$0xff]  ;;  %v1335_v10 = vld [vmem:[%s2376_s16 + $0x1c0] sm:$0xff] }
  0x7e   : > { %1680 = vmatpush.msrb.mxu2 %v1338_v7  ;;  %1703 = vmatpush.msrb.mxu3 %v1342_v31 }
  0x7f   : > { %1634 = vmatpush.msrb.mxu0 %v1330_v9  ;;  %1657 = vmatpush.msrb.mxu1 %v1334_v32 }
  0x80   : > { %1681 = vmatpush.msrb.mxu2 %v1337_v11  ;;  %1704 = vmatpush.msrb.mxu3 %v1341_v33 }
  0x81   : > { %1635 = vmatpush.msrb.mxu0 %v1329_v4  ;;  %1658 = vmatpush.msrb.mxu1 %v1333_v34 }
  0x82   : > { %1682 = vmatpush.msrb.mxu2 %v1336_v6  ;;  %1705 = vmatpush.msrb.mxu3 %v1340_v35 }
  0x83   : > { %1636 = vmatpush.msrb.mxu0 %v1328_v8  ;;  %1659 = vmatpush.msrb.mxu1 %v1332_v36 }
  0x84   : > { %1683 = vmatpush.msrb.mxu2 %v1335_v10  ;;  %1706 = vmatpush.msrb.mxu3 %v1339_v37 }
  0x85   : > { %1637 = vmatpush.msrb.mxu0 %v1327_v17  ;;  %1660 = vmatpush.msrb.mxu1 %v1331_v38 }
  0x86   : > { %1980 = vmatmul.msk.f32.vlgmr.msrb.gmra.mxu0 %vm478_vm0, %v2239_v40  ;;  %1981 = vmatmul.msk.f32.vlgmr.msrb.gmra.mxu1 %vm478_vm0, %v2245_v42 }
  0x87   : > { %1982 = vmatmul.msk.f32.vlgmr.msrb.gmra.mxu2 %vm478_vm0, %v2251_v49  ;;  %1983 = vmatmul.msk.f32.vlgmr.msrb.gmra.mxu3 %vm478_vm0, %v2257_v54 }
  0x97   : > { %v2482_v20 = vpop.f32.mrf.mxu0  ;;  %v2484_v39 = vpop.f32.mrf.mxu1 }
  0x9e   : > { %v2486_v41 = vpop.f32.mrf.mxu2 }
  0x9f   : > { %v2488_v23 = vpop.f32.mrf.mxu3  ;;  %v2490_v43 = vpop.f32.mrf.mxu0 }
  0xa0   : > { %v2492_v40 = vpop.f32.mrf.mxu1 }
  0xa6   : > { %v2494_v42 = vpop.f32.mrf.mxu2 }
  0xa7   : > { %v2496_v56 = vpop.f32.mrf.mxu3 }
  0xa9   : > { %v2498_v49 = vpop.f32.mrf.mxu0  ;;  %v2500_v54 = vpop.f32.mrf.mxu1 }
  0xb0   : > { %v2502_v50 = vpop.f32.mrf.mxu2  ;;  %v2504_v25 = vpop.f32.mrf.mxu3 }
  0xb3   : > { %v2506_v55 = vpop.f32.mrf.mxu0  ;;  %v2508_v57 = vpop.f32.mrf.mxu1 }
  0xba   : > { %v2510_v58 = vpop.f32.mrf.mxu2  ;;  %v2512_v59 = vpop.f32.mrf.mxu3 }
  0xbd   : > { %v931_v60 = vpop.f32.mrf.mxu0  ;;  %v954_v61 = vpop.f32.mrf.mxu1 }
  0xbe   : > { %v1711_v62 = vsub.f32 %v2482_v20, %v931_v60  ;;  %v1712_v63 = vsub.f32 %v2484_v39, %v954_v61 }
  0xc0   : > { %1728 = vst.msk [vmem:[%s2518_s19] sm:$0x3] %vm1727_vm1, %v1711_v62 }
  0xc1   : > { %1729 = vst.msk [vmem:[%s2518_s19 + $0x2] sm:$0x3] %vm1727_vm1, %v1712_v63 }
  0xc4   : > { %v977_v0 = vpop.f32.mrf.mxu2  ;;  %v1000_v1 = vpop.f32.mrf.mxu3 }
  0xc5   : > { %v1713_v16 = vsub.f32 %v2486_v41, %v977_v0  ;;  %v1714_v45 = vsub.f32 %v2488_v23, %v1000_v1 }
  0xc7   : > { %1730 = vst.msk [vmem:[%s2518_s19 + $0x4] sm:$0x3] %vm1727_vm1, %v1713_v16  ;;  %v1023_v19 = vpop.f32.mrf.mxu0  ;;  %v1046_v2 = vpop.f32.mrf.mxu1 }
  0xc8   : > { %1731 = vst.msk [vmem:[%s2518_s19 + $0x6] sm:$0x3] %vm1727_vm1, %v1714_v45  ;;  %v1715_v21 = vsub.f32 %v2490_v43, %v1023_v19  ;;  %v1716_v47 = vsub.f32 %v2492_v40, %v1046_v2 }
  0xca   : > { %1732 = vst.msk [vmem:[%s2518_s19 + $0x8] sm:$0x3] %vm1727_vm1, %v1715_v21 }
  0xcb   : > { %1733 = vst.msk [vmem:[%s2518_s19 + $0xa] sm:$0x3] %vm1727_vm1, %v1716_v47 }
  0xce   : > { %v1069_v24 = vpop.f32.mrf.mxu2  ;;  %v1092_v3 = vpop.f32.mrf.mxu3 }
  0xcf   : > { %v1717_v51 = vsub.f32 %v2494_v42, %v1069_v24  ;;  %v1718_v12 = vsub.f32 %v2496_v56, %v1092_v3 }
  0xd1   : > { %1734 = vst.msk [vmem:[%s2518_s19 + $0xc] sm:$0x3] %vm1727_vm1, %v1717_v51  ;;  %v1115_v53 = vpop.f32.mrf.mxu0  ;;  %v1138_v13 = vpop.f32.mrf.mxu1 }
  0xd2   : > { %1735 = vst.msk [vmem:[%s2518_s19 + $0xe] sm:$0x3] %vm1727_vm1, %v1718_v12  ;;  %v1719_v14 = vsub.f32 %v2498_v49, %v1115_v53  ;;  %v1720_v15 = vsub.f32 %v2500_v54, %v1138_v13 }
  0xd4   : > { %1736 = vst.msk [vmem:[%s2518_s19 + $0x10] sm:$0x3] %vm1727_vm1, %v1719_v14 }
  0xd5   : > { %1737 = vst.msk [vmem:[%s2518_s19 + $0x12] sm:$0x3] %vm1727_vm1, %v1720_v15 }
  0xd8   : > { %v1161_v18 = vpop.f32.mrf.mxu2  ;;  %v1184_v22 = vpop.f32.mrf.mxu3 }
  0xd9   : > { %v1721_v44 = vsub.f32 %v2502_v50, %v1161_v18  ;;  %v1722_v26 = vsub.f32 %v2504_v25, %v1184_v22 }
  0xdb   : > { %1738 = vst.msk [vmem:[%s2518_s19 + $0x14] sm:$0x3] %vm1727_vm1, %v1721_v44  ;;  %v1207_v46 = vpop.f32.mrf.mxu0  ;;  %v1230_v27 = vpop.f32.mrf.mxu1 }
  0xdc   : > { %1739 = vst.msk [vmem:[%s2518_s19 + $0x16] sm:$0x3] %vm1727_vm1, %v1722_v26  ;;  %v1723_v48 = vsub.f32 %v2506_v55, %v1207_v46  ;;  %v1724_v28 = vsub.f32 %v2508_v57, %v1230_v27 }
  0xde   : > { %1740 = vst.msk [vmem:[%s2518_s19 + $0x18] sm:$0x3] %vm1727_vm1, %v1723_v48 }
  0xdf   : > { %1741 = vst.msk [vmem:[%s2518_s19 + $0x1a] sm:$0x3] %vm1727_vm1, %v1724_v28 }
  0xe2   : > { %v1253_v52 = vpop.f32.mrf.mxu2  ;;  %v1276_v29 = vpop.f32.mrf.mxu3 }
  0xe3   : > { %v1725_v5 = vsub.f32 %v2510_v58, %v1253_v52  ;;  %v1726_v30 = vsub.f32 %v2512_v59, %v1276_v29 }
  0xe5   : > { %1742 = vst.msk [vmem:[%s2518_s19 + $0x1c] sm:$0x3] %vm1727_vm1, %v1725_v5  ;;  %v1363_v7 = vpop.f32.mrf.mxu0  ;;  %v1386_v31 = vpop.f32.mrf.mxu1 }
  0xe6   : > { %1743 = vst.msk [vmem:[%s2518_s19 + $0x1e] sm:$0x3] %vm1727_vm1, %v1726_v30  ;;  %v1744_v9 = vadd.f32 %v1363_v7, %v2482_v20  ;;  %v1745_v32 = vadd.f32 %v1386_v31, %v2484_v39 }
  0xe8   : > { %1760 = vst.msk [vmem:[%s2570_s23] sm:$0x3] %vm1727_vm1, %v1744_v9 }
  0xe9   : > { %1761 = vst.msk [vmem:[%s2570_s23 + $0x2] sm:$0x3] %vm1727_vm1, %v1745_v32 }
  0xec   : > { %v1409_v11 = vpop.f32.mrf.mxu2  ;;  %v1432_v33 = vpop.f32.mrf.mxu3 }
  0xed   : > { %v1746_v4 = vadd.f32 %v1409_v11, %v2486_v41  ;;  %v1747_v34 = vadd.f32 %v1432_v33, %v2488_v23 }
  0xef   : > { %1762 = vst.msk [vmem:[%s2570_s23 + $0x4] sm:$0x3] %vm1727_vm1, %v1746_v4  ;;  %v1455_v6 = vpop.f32.mrf.mxu0  ;;  %v1478_v35 = vpop.f32.mrf.mxu1 }
  0xf0   : > { %1763 = vst.msk [vmem:[%s2570_s23 + $0x6] sm:$0x3] %vm1727_vm1, %v1747_v34  ;;  %v1748_v8 = vadd.f32 %v1455_v6, %v2490_v43  ;;  %v1749_v36 = vadd.f32 %v1478_v35, %v2492_v40 }
  0xf2   : > { %1764 = vst.msk [vmem:[%s2570_s23 + $0x8] sm:$0x3] %vm1727_vm1, %v1748_v8 }
  0xf3   : > { %1765 = vst.msk [vmem:[%s2570_s23 + $0xa] sm:$0x3] %vm1727_vm1, %v1749_v36 }
  0xf6   : > { %v1501_v10 = vpop.f32.mrf.mxu2  ;;  %v1524_v37 = vpop.f32.mrf.mxu3 }
  0xf7   : > { %v1750_v17 = vadd.f32 %v1501_v10, %v2494_v42  ;;  %v1751_v38 = vadd.f32 %v1524_v37, %v2496_v56 }
  0xf9   : > { %1766 = vst.msk [vmem:[%s2570_s23 + $0xc] sm:$0x3] %vm1727_vm1, %v1750_v17  ;;  %v1547_v20 = vpop.f32.mrf.mxu0  ;;  %v1570_v39 = vpop.f32.mrf.mxu1 }
  0xfa   : > { %1767 = vst.msk [vmem:[%s2570_s23 + $0xe] sm:$0x3] %vm1727_vm1, %v1751_v38  ;;  %v1752_v41 = vadd.f32 %v1547_v20, %v2498_v49  ;;  %v1753_v23 = vadd.f32 %v1570_v39, %v2500_v54 }
  0xfc   : > { %1768 = vst.msk [vmem:[%s2570_s23 + $0x10] sm:$0x3] %vm1727_vm1, %v1752_v41 }
  0xfd   : > { %1769 = vst.msk [vmem:[%s2570_s23 + $0x12] sm:$0x3] %vm1727_vm1, %v1753_v23 }
 0x100   : > { %v1593_v43 = vpop.f32.mrf.mxu2  ;;  %v1616_v40 = vpop.f32.mrf.mxu3 }
 0x101   : > { %v1754_v42 = vadd.f32 %v1593_v43, %v2502_v50  ;;  %v1755_v56 = vadd.f32 %v1616_v40, %v2504_v25 }
 0x103   : > { %1770 = vst.msk [vmem:[%s2570_s23 + $0x14] sm:$0x3] %vm1727_vm1, %v1754_v42  ;;  %v1639_v60 = vpop.f32.mrf.mxu0  ;;  %v1662_v61 = vpop.f32.mrf.mxu1 }
 0x104   : > { %1771 = vst.msk [vmem:[%s2570_s23 + $0x16] sm:$0x3] %vm1727_vm1, %v1755_v56  ;;  %v1756_v49 = vadd.f32 %v1639_v60, %v2506_v55  ;;  %v1757_v54 = vadd.f32 %v1662_v61, %v2508_v57 }
 0x106   : > { %1772 = vst.msk [vmem:[%s2570_s23 + $0x18] sm:$0x3] %vm1727_vm1, %v1756_v49 }
 0x107   : > { %1773 = vst.msk [vmem:[%s2570_s23 + $0x1a] sm:$0x3] %vm1727_vm1, %v1757_v54 }
 0x10a   : > { %v1685_v62 = vpop.f32.mrf.mxu2  ;;  %v1708_v63 = vpop.f32.mrf.mxu3 }
 0x10b   : > { %v1758_v50 = vadd.f32 %v1685_v62, %v2510_v58  ;;  %v1759_v25 = vadd.f32 %v1708_v63, %v2512_v59 }
 0x10d   : > { %1774 = vst.msk [vmem:[%s2570_s23 + $0x1c] sm:$0x3] %vm1727_vm1, %v1758_v50 }
 0x10e   : > { %1775 = vst.msk [vmem:[%s2570_s23 + $0x1e] sm:$0x3] %vm1727_vm1, %v1759_v25 }
 0x10f PF: > { %s17_s21 = sadd.s32 1, %s2003_s21  }
 0x110   : > { %p14_p4 = scmp.ge.s32.totalorder %s17_s21, 4  }
 0x112   :  { %16 = sbr.rel (!%p14_p4) target bundleno = 1 (0x1), region = 94 }

// kernel: reverse.8
= control target key start
LH: loop header
LB: loop body
LE: loop exit
PB: predicated region body
PF: predicated region fallthrough
CT: control target
= control target key end

     0   :  { %s344_s0 = inlined_call_operand.vmem [shape: f32[32,2,16,7], index: 0, kind: input, shape index: {}]   ;;  %s345_s1 = inlined_call_operand.vmem [shape: f32[32,2,16,7], index: 1, kind: output, shape index: {}]  }
   0x1   :  { %v112_v0 = vld [vmem:[%s344_s0 + $0x60] sm:$0xff]  ;;  %v113_v1 = vld [vmem:[%s344_s0 + $0xd0] sm:$0xff]  ;;  %v138_v14 = vld [vmem:[%s344_s0 + $0x68] sm:$0xff] }
   0x2   :  { %v115_v2 = vld [vmem:[%s344_s0 + $0x50] sm:$0xff]  ;;  %4 = vst [vmem:[%s345_s1] sm:$0xff] %v112_v0  ;;  %v117_v3 = vld [vmem:[%s344_s0 + $0xc0] sm:$0xff]  ;;  %v140_v15 = vld [vmem:[%s344_s0 + $0xd8] sm:$0xff] }
   0x3   :  { %114 = vst [vmem:[%s345_s1 + $0x70] sm:$0xff] %v113_v1  ;;  %v119_v4 = vld [vmem:[%s344_s0 + $0x40] sm:$0xff]  ;;  %v121_v5 = vld [vmem:[%s344_s0 + $0xb0] sm:$0xff]  ;;  %v142_v16 = vld [vmem:[%s344_s0 + $0x58] sm:$0xff] }
   0x4   :  { %116 = vst [vmem:[%s345_s1 + $0x10] sm:$0xff] %v115_v2  ;;  %v123_v6 = vld [vmem:[%s344_s0 + $0x30] sm:$0xff]  ;;  %v125_v7 = vld [vmem:[%s344_s0 + $0xa0] sm:$0xff]  ;;  %v144_v17 = vld [vmem:[%s344_s0 + $0xc8] sm:$0xff] }
   0x5   :  { %118 = vst [vmem:[%s345_s1 + $0x80] sm:$0xff] %v117_v3  ;;  %v127_v8 = vld [vmem:[%s344_s0 + $0x20] sm:$0xff]  ;;  %v129_v9 = vld [vmem:[%s344_s0 + $0x90] sm:$0xff]  ;;  %v146_v18 = vld [vmem:[%s344_s0 + $0x48] sm:$0xff] }
   0x6   :  { %120 = vst [vmem:[%s345_s1 + $0x20] sm:$0xff] %v119_v4  ;;  %v131_v10 = vld [vmem:[%s344_s0 + $0x10] sm:$0xff]  ;;  %v133_v11 = vld [vmem:[%s344_s0 + $0x80] sm:$0xff]  ;;  %v148_v19 = vld [vmem:[%s344_s0 + $0xb8] sm:$0xff] }
   0x7   :  { %122 = vst [vmem:[%s345_s1 + $0x90] sm:$0xff] %v121_v5  ;;  %v49_v12 = vld [vmem:[%s344_s0] sm:$0xff]  ;;  %v136_v13 = vld [vmem:[%s344_s0 + $0x70] sm:$0xff]  ;;  %v150_v20 = vld [vmem:[%s344_s0 + $0x38] sm:$0xff] }
   0x8   :  { %124 = vst [vmem:[%s345_s1 + $0x30] sm:$0xff] %v123_v6  ;;  %v152_v21 = vld [vmem:[%s344_s0 + $0xa8] sm:$0xff]  ;;  %v156_v23 = vld [vmem:[%s344_s0 + $0x98] sm:$0xff] }
   0x9   :  { %126 = vst [vmem:[%s345_s1 + $0xa0] sm:$0xff] %v125_v7  ;;  %v154_v22 = vld [vmem:[%s344_s0 + $0x28] sm:$0xff]  ;;  %v158_v24 = vld [vmem:[%s344_s0 + $0x18] sm:$0xff] }
   0xa   :  { %128 = vst [vmem:[%s345_s1 + $0x40] sm:$0xff] %v127_v8  ;;  %v160_v25 = vld [vmem:[%s344_s0 + $0x88] sm:$0xff]  ;;  %v164_v27 = vld [vmem:[%s344_s0 + $0x78] sm:$0xff] }
   0xb   :  { %130 = vst [vmem:[%s345_s1 + $0xb0] sm:$0xff] %v129_v9  ;;  %v162_v26 = vld [vmem:[%s344_s0 + $0x8] sm:$0xff] }
   0xc   :  { %132 = vst [vmem:[%s345_s1 + $0x50] sm:$0xff] %v131_v10 }
   0xd   :  { %134 = vst [vmem:[%s345_s1 + $0xc0] sm:$0xff] %v133_v11 }
   0xe   :  { %135 = vst [vmem:[%s345_s1 + $0x60] sm:$0xff] %v49_v12 }
   0xf   :  { %137 = vst [vmem:[%s345_s1 + $0xd0] sm:$0xff] %v136_v13 }
  0x10   :  { %139 = vst [vmem:[%s345_s1 + $0x8] sm:$0xff] %v138_v14 }
  0x11   :  { %141 = vst [vmem:[%s345_s1 + $0x78] sm:$0xff] %v140_v15 }
  0x12   :  { %143 = vst [vmem:[%s345_s1 + $0x18] sm:$0xff] %v142_v16 }
  0x13   :  { %145 = vst [vmem:[%s345_s1 + $0x88] sm:$0xff] %v144_v17 }
  0x14   :  { %147 = vst [vmem:[%s345_s1 + $0x28] sm:$0xff] %v146_v18 }
  0x15   :  { %149 = vst [vmem:[%s345_s1 + $0x98] sm:$0xff] %v148_v19 }
  0x16   :  { %151 = vst [vmem:[%s345_s1 + $0x38] sm:$0xff] %v150_v20 }
  0x17   :  { %153 = vst [vmem:[%s345_s1 + $0xa8] sm:$0xff] %v152_v21 }
  0x18   :  { %155 = vst [vmem:[%s345_s1 + $0x48] sm:$0xff] %v154_v22 }
  0x19   :  { %157 = vst [vmem:[%s345_s1 + $0xb8] sm:$0xff] %v156_v23 }
  0x1a   :  { %159 = vst [vmem:[%s345_s1 + $0x58] sm:$0xff] %v158_v24 }
  0x1b   :  { %161 = vst [vmem:[%s345_s1 + $0xc8] sm:$0xff] %v160_v25 }
  0x1c   :  { %163 = vst [vmem:[%s345_s1 + $0x68] sm:$0xff] %v162_v26 }
  0x1d   :  { %165 = vst [vmem:[%s345_s1 + $0xd8] sm:$0xff] %v164_v27 }

// kernel: fno_block2d_forward.12
= control target key start
LH: loop header
LB: loop body
LE: loop exit
PB: predicated region body
PF: predicated region fallthrough
CT: control target
= control target key end

     0   :  { %s652_s15 = smov 0   ;;  %s654_s16 = smov 0   ;;  %s790_s0 = inlined_call_operand.vmem [shape: f32[32,512], index: 0, kind: input, shape index: {}]   ;;  %s791_s1 = inlined_call_operand.vmem [shape: f32[32,32], index: 1, kind: input, shape index: {}]   ;;  %s792_s2 = inlined_call_operand.vmem [shape: f32[32,1], index: 2, kind: input, shape index: {}]   ;;  %s793_s3 = inlined_call_operand.vmem [shape: f32[32,512], index: 3, kind: input, shape index: {}]   ;;  %s794_s4 = inlined_call_operand.vmem [shape: f32[32,512], index: 4, kind: output, shape index: {}]  }
   0x1   :  { %s656_s17 = smov 0  }
   0x2 LB: > { %s537_s18 = sadd.s32 4294967295, %s624_s17   ;;  %s669_s19 = sadd.s32 1, %s624_s17   ;;  %s624_s17 = sphi %s656_s17, %s799_s17   ;;  %s620_s16 = sphi %s654_s16, %s798_s16   ;;  %s616_s15 = sphi %s652_s15, %s797_s15  }
   0x3   : > { %s18_s20 = ssub.s32 %s624_s17, %s669_s19  ;;  %s21_s21 = sadd.s32 1, %s620_s16 }
   0x4   : > { %p19_p0 = scmp.eq.s32.totalorder %s18_s20, 0  ;;  %p28_p1 = scmp.ne.s32.totalorder %s620_s16, %s616_s15 }
   0x5   : > { %p29_p2 = scmp.eq.s32.totalorder %s624_s17, 0  ;;  %p126_p3 = scmp.eq.s32.totalorder %s537_s18, 1 }
   0x6   : > { %s680_s22 = scalar_select %p19_p0, %s620_s16, %s21_s21  }
   0x7   : > { %p682_p4 = por %p29_p2, %p28_p1  ;;  %p686_p5 = por %p126_p3, %p28_p1 }
   0x8   : > { %p540_p6 = scmp.ge.s32.totalorder %s624_s17, 2 }
   0xa   : > { %154 = sbr.rel (%p540_p6) target bundleno = 39 (0x27), region = 24 }
   0xf   : > { %157 = sbr.rel (!%p682_p4) target bundleno = 27 (0x1b), region = 28  ;;  %s159_s25 = sand.u32 (%p682_p4), 1, %s620_s16  }
  0x10   : > { %s564_s26 = sshll.u32 (%p682_p4), %s624_s17, 4  ;;  %s541_s27 = sshll.u32 (%p682_p4), %s159_s25, 6 }
  0x11   : > { %s164_s30 = scalar_lea.vmem (%p682_p4), %s790_s0, %s564_s26  ;;  %s161_s5 = scalar_lea.vmem (%p682_p4), [#allocation2], %s541_s27 }
  0x12   : > { %v177_v0 = vld [vmem:[%s164_s30] sm:$0xff] (%p682_p4)  ;;  %v179_v1 = vld [vmem:[%s164_s30 + $0x8] sm:$0xff] (%p682_p4) }
  0x13   : > { %v181_v2 = vld [vmem:[%s164_s30 + $0x20] sm:$0xff] (%p682_p4)  ;;  %178 = vst [vmem:[%s161_s5] sm:$0xff] (%p682_p4), %v177_v0  ;;  %v183_v3 = vld [vmem:[%s164_s30 + $0x28] sm:$0xff] (%p682_p4) }
  0x14   : > { %180 = vst [vmem:[%s161_s5 + $0x8] sm:$0xff] %v179_v1  ;;  %v185_v4 = vld [vmem:[%s164_s30 + $0x40] sm:$0xff]  ;;  %v187_v5 = vld [vmem:[%s164_s30 + $0x48] sm:$0xff] }
  0x15   : > { %182 = vst [vmem:[%s161_s5 + $0x10] sm:$0xff] %v181_v2  ;;  %v189_v6 = vld [vmem:[%s164_s30 + $0x60] sm:$0xff]  ;;  %v191_v7 = vld [vmem:[%s164_s30 + $0x68] sm:$0xff] }
  0x16   : > { %184 = vst [vmem:[%s161_s5 + $0x18] sm:$0xff] %v183_v3 }
  0x17   : > { %186 = vst [vmem:[%s161_s5 + $0x20] sm:$0xff] %v185_v4 }
  0x18   : > { %188 = vst [vmem:[%s161_s5 + $0x28] sm:$0xff] %v187_v5 }
  0x19   : > { %190 = vst [vmem:[%s161_s5 + $0x30] sm:$0xff] %v189_v6 }
  0x1a   : > { %192 = vst [vmem:[%s161_s5 + $0x38] sm:$0xff] %v191_v7 }
  0x1b PF: > { %198 = sbr.rel (!%p682_p4) target bundleno = 39 (0x27), region = 51  ;;  %s200_s6 = sand.u32 (%p682_p4), 1, %s620_s16  }
  0x1c   : > { %s565_s7 = sshll.u32 (%p682_p4), %s624_s17, 4  ;;  %s544_s8 = sshll.u32 (%p682_p4), %s200_s6, 6 }
  0x1d   : > { %s205_s11 = scalar_lea.vmem (%p682_p4), %s793_s3, %s565_s7  ;;  %s202_s12 = scalar_lea.vmem (%p682_p4), [#allocation3], %s544_s8 }
  0x1e   : > { %v218_v8 = vld [vmem:[%s205_s11] sm:$0xff] (%p682_p4)  ;;  %v220_v9 = vld [vmem:[%s205_s11 + $0x8] sm:$0xff] (%p682_p4) }
  0x1f   : > { %v222_v10 = vld [vmem:[%s205_s11 + $0x20] sm:$0xff] (%p682_p4)  ;;  %219 = vst [vmem:[%s202_s12] sm:$0xff] (%p682_p4), %v218_v8  ;;  %v224_v11 = vld [vmem:[%s205_s11 + $0x28] sm:$0xff] (%p682_p4) }
  0x20   : > { %221 = vst [vmem:[%s202_s12 + $0x8] sm:$0xff] %v220_v9  ;;  %v226_v12 = vld [vmem:[%s205_s11 + $0x40] sm:$0xff]  ;;  %v228_v13 = vld [vmem:[%s205_s11 + $0x48] sm:$0xff] }
  0x21   : > { %223 = vst [vmem:[%s202_s12 + $0x10] sm:$0xff] %v222_v10  ;;  %v230_v14 = vld [vmem:[%s205_s11 + $0x60] sm:$0xff]  ;;  %v232_v15 = vld [vmem:[%s205_s11 + $0x68] sm:$0xff] }
  0x22   : > { %225 = vst [vmem:[%s202_s12 + $0x18] sm:$0xff] %v224_v11 }
  0x23   : > { %227 = vst [vmem:[%s202_s12 + $0x20] sm:$0xff] %v226_v12 }
  0x24   : > { %229 = vst [vmem:[%s202_s12 + $0x28] sm:$0xff] %v228_v13 }
  0x25   : > { %231 = vst [vmem:[%s202_s12 + $0x30] sm:$0xff] %v230_v14 }
  0x26   : > { %233 = vst [vmem:[%s202_s12 + $0x38] sm:$0xff] %v232_v15 }
  0x27 PF: > { %p547_p7 = scmp.ge.s32.totalorder %s624_s17, 1  ;;  %p238_p8 = scmp.lt.s32.totalorder %s624_s17, 3 }
  0x29   : > { %p239_p9 = pnand %p547_p7, %p238_p8 }
  0x2a   : > { %s245_s13 = sand.u32 (!%p239_p9), 1, %s616_s15  }
  0x2b   : > { %242 = sbr.rel (%p239_p9) target bundleno = 215 (0xd7), region = 74  ;;  %s708_s14 = sshll.u32 (!%p239_p9), %s245_s13, 6 }
  0x2c   : > { %s247_s26 = scalar_lea.vmem (!%p239_p9), [#allocation2], %s708_s14  ;;  %s744_s12 = scalar_lea.vmem (!%p239_p9), [#allocation3], %s708_s14 }
  0x2d   : > { %s750_s13 = scalar_lea.vmem (!%p239_p9), [#allocation4], %s708_s14 }
  0x30   : > { %v626_v16 = vmov 0   ;;  %v297_v17 = vld [vmem:[%s792_s2 + $0x10] sm:$0xff]  ;;  %v295_v18 = vld [vmem:[%s792_s2] sm:$0xff]  ;;  %v294_v20 = vld [vmem:[%s247_s26 + $0x38] sm:$0xff]  ;;  %vm319_vm0 = vcmask 261120   ;;  %s566_s14 = sshll.u32 (%p686_p5), %s537_s18, 4 }
  0x31   : > { %601 = vset.pattern.permute.xlu1 %v626_v16  ;;  %600 = vset.pattern.permute.xlu0 %v626_v16  ;;  %v293_v19 = vld [vmem:[%s247_s26 + $0x30] sm:$0xff]  ;;  %v291_v21 = vld [vmem:[%s247_s26 + $0x20] sm:$0xff]  ;;  %v292_v22 = vld [vmem:[%s247_s26 + $0x28] sm:$0xff]  ;;  %s431_s23 = scalar_lea.vmem (%p686_p5), %s794_s4, %s566_s14 }
  0x32   : > { %311 = vperm.xlu1 %601, %v297_v17   ;;  %301 = vperm.xlu0 %600, %v295_v18   ;;  %v289_v23 = vld [vmem:[%s247_s26 + $0x10] sm:$0xff]  ;;  %v290_v24 = vld [vmem:[%s247_s26 + $0x18] sm:$0xff]  ;;  %v287_v25 = vld [vmem:[%s247_s26] sm:$0xff] }
  0x33   : > { %344 = vmatpush.msra.mxu0 %v293_v19  ;;  %567 = vmatpush.msra.mxu2 %v293_v19  ;;  %v288_v26 = vld [vmem:[%s247_s26 + $0x8] sm:$0xff]  ;;  %v283_v27 = vld [vmem:[%s791_s1] sm:$0xff]  ;;  %v285_v28 = vld [vmem:[%s791_s1 + $0x10] sm:$0xff] }
  0x34   : > { %373 = vmatpush.msra.mxu1 %v294_v20  ;;  %571 = vmatpush.msra.mxu3 %v294_v20  ;;  %v298_v29 = vld [vmem:[%s792_s2 + $0x18] sm:$0xff]  ;;  %v296_v30 = vld [vmem:[%s792_s2 + $0x8] sm:$0xff]  ;;  %v390_v35 = vld [vmem:[%s744_s12] sm:$0xff] }
  0x35   : > { %345 = vmatpush.msra.mxu0 %v291_v21  ;;  %568 = vmatpush.msra.mxu2 %v291_v21  ;;  %v284_v31 = vld [vmem:[%s791_s1 + $0x8] sm:$0xff]  ;;  %v286_v32 = vld [vmem:[%s791_s1 + $0x18] sm:$0xff]  ;;  %v394_v46 = vld [vmem:[%s744_s12 + $0x20] sm:$0xff] }
  0x36   : > { %374 = vmatpush.msra.mxu1 %v292_v22  ;;  %572 = vmatpush.msra.mxu3 %v292_v22  ;;  %v391_v38 = vld [vmem:[%s744_s12 + $0x8] sm:$0xff]  ;;  %v392_v53 = vld [vmem:[%s744_s12 + $0x10] sm:$0xff]  ;;  %v393_v57 = vld [vmem:[%s744_s12 + $0x18] sm:$0xff] }
  0x37   : > { %346 = vmatpush.msra.mxu0 %v289_v23  ;;  %569 = vmatpush.msra.mxu2 %v289_v23  ;;  %v395_v49 = vld [vmem:[%s744_s12 + $0x28] sm:$0xff]  ;;  %v396_v4 = vld [vmem:[%s744_s12 + $0x30] sm:$0xff]  ;;  %v397_v7 = vld [vmem:[%s744_s12 + $0x38] sm:$0xff] }
  0x38   : > { %375 = vmatpush.msra.mxu1 %v290_v24  ;;  %573 = vmatpush.msra.mxu3 %v290_v24 }
  0x39   : > { %347 = vmatpush.msra.mxu0 %v287_v25  ;;  %570 = vmatpush.msra.mxu2 %v287_v25 }
  0x3a   : > { %376 = vmatpush.msra.mxu1 %v288_v26  ;;  %574 = vmatpush.msra.mxu3 %v288_v26 }
  0x3b   : > { %551 = vmatmul.msk.f32.vlgmr.msra.gmra.mxu0 %vm319_vm0, %v283_v27  ;;  %553 = vmatmul.msk.f32.vlgmr.msra.gmra.mxu2 %vm319_vm0, %v285_v28 }
  0x3c   : > { %555 = vmatmul.msk.f32.vlgmr.msra.gmra.mxu1 %vm319_vm0, %v283_v27  ;;  %557 = vmatmul.msk.f32.vlgmr.msra.gmra.mxu3 %vm319_vm0, %v285_v28 }
  0x3d   : > { %316 = vperm.xlu1 %601, %v298_v29   ;;  %306 = vperm.xlu0 %600, %v296_v30  }
  0x43   : > { %552 = vmatmul.msk.f32.gmra.mxu0 %vm319_vm0, %v284_v31  ;;  %554 = vmatmul.msk.f32.gmra.mxu2 %vm319_vm0, %v286_v32 }
  0x44   : > { %556 = vmatmul.msk.f32.gmra.mxu1 %vm319_vm0, %v284_v31  ;;  %558 = vmatmul.msk.f32.gmra.mxu3 %vm319_vm0, %v286_v32 }
  0xa4   : > { %v302_v33 = vpop.permute.xlu0 %301  ;;  %v312_v41 = vpop.permute.xlu1 %311 }
  0xaf   : > { %v307_v50 = vpop.permute.xlu0 %306  ;;  %v317_v1 = vpop.permute.xlu1 %316 }
  0xb8   : > { %v349_v34 = vpop.f32.mrf.mxu0 }
  0xb9   : > { %v350_v36 = vadd.f32 %v349_v34, %v302_v33  ;;  %v378_v37 = vpop.f32.mrf.mxu1 }
  0xba   : > { %v379_v39 = vadd.f32 %v378_v37, %v302_v33 }
  0xbb   : > { %v398_v40 = vadd.f32 %v390_v35, %v350_v36 }
  0xbc   : > { %v399_v42 = vadd.f32 %v391_v38, %v379_v39 }
  0xbd   : > { %v406_v43 = vmax.f32 %v398_v40, 0.0 }
  0xbe   : > { %v407_v44 = vmax.f32 %v399_v42, 0.0  ;;  %v355_v45 = vpop.f32.mrf.mxu2 }
  0xbf   : > { %414 = vst [vmem:[%s750_s13] sm:$0xff] %v406_v43  ;;  %v356_v47 = vadd.f32 %v355_v45, %v312_v41  ;;  %v384_v48 = vpop.f32.mrf.mxu3 }
  0xc0   : > { %415 = vst [vmem:[%s750_s13 + $0x8] sm:$0xff] %v407_v44  ;;  %v385_v51 = vadd.f32 %v384_v48, %v312_v41  ;;  %v352_v52 = vpop.f32.mrf.mxu0 }
  0xc1   : > { %v402_v54 = vadd.f32 %v394_v46, %v356_v47  ;;  %v353_v55 = vadd.f32 %v352_v52, %v307_v50  ;;  %v381_v56 = vpop.f32.mrf.mxu1 }
  0xc2   : > { %v403_v58 = vadd.f32 %v395_v49, %v385_v51  ;;  %v382_v59 = vadd.f32 %v381_v56, %v307_v50 }
  0xc3   : > { %v410_v60 = vmax.f32 %v402_v54, 0.0  ;;  %v400_v61 = vadd.f32 %v392_v53, %v353_v55 }
  0xc4   : > { %v411_v62 = vmax.f32 %v403_v58, 0.0  ;;  %v401_v63 = vadd.f32 %v393_v57, %v382_v59 }
  0xc5   : > { %418 = vst [vmem:[%s750_s13 + $0x20] sm:$0xff] %v410_v60  ;;  %v408_v0 = vmax.f32 %v400_v61, 0.0 }
  0xc6   : > { %419 = vst [vmem:[%s750_s13 + $0x28] sm:$0xff] %v411_v62  ;;  %v409_v2 = vmax.f32 %v401_v63, 0.0  ;;  %v358_v3 = vpop.f32.mrf.mxu2  ;;  %v444_v13 = vld [vmem:[%s750_s13] sm:$0xff] (%p686_p5) }
  0xc7   : > { %416 = vst [vmem:[%s750_s13 + $0x10] sm:$0xff] %v408_v0  ;;  %v359_v5 = vadd.f32 %v358_v3, %v317_v1  ;;  %v387_v6 = vpop.f32.mrf.mxu3  ;;  %v446_v14 = vld [vmem:[%s750_s13 + $0x8] sm:$0xff] (%p686_p5) }
  0xc8   : > { %417 = vst [vmem:[%s750_s13 + $0x18] sm:$0xff] %v409_v2  ;;  %v388_v8 = vadd.f32 %v387_v6, %v317_v1 }
  0xc9   : > { %v404_v9 = vadd.f32 %v396_v4, %v359_v5  ;;  %445 = vst [vmem:[%s431_s23] sm:$0xff] (%p686_p5), %v444_v13 }
  0xca   : > { %v405_v10 = vadd.f32 %v397_v7, %v388_v8  ;;  %428 = sbr.rel (!%p686_p5) target bundleno = 215 (0xd7), region = 86  ;;  %447 = vst [vmem:[%s431_s23 + $0x8] sm:$0xff] (%p686_p5), %v446_v14 }
  0xcb   : > { %v412_v11 = vmax.f32 %v404_v9, 0.0 }
  0xcc   : > { %v413_v12 = vmax.f32 %v405_v10, 0.0  ;;  %v452_v17 = vld [vmem:[%s750_s13 + $0x20] sm:$0xff] (%p686_p5) }
  0xcd   : > { %420 = vst [vmem:[%s750_s13 + $0x30] sm:$0xff] %v412_v11  ;;  %v454_v18 = vld [vmem:[%s750_s13 + $0x28] sm:$0xff] (%p686_p5) }
  0xce   : > { %421 = vst [vmem:[%s750_s13 + $0x38] sm:$0xff] %v413_v12  ;;  %v448_v15 = vld [vmem:[%s750_s13 + $0x10] sm:$0xff] (%p686_p5) }
  0xcf   : > { %v450_v16 = vld [vmem:[%s750_s13 + $0x18] sm:$0xff]  ;;  %449 = vst [vmem:[%s431_s23 + $0x20] sm:$0xff] %v448_v15 }
  0xd0   : > { %451 = vst [vmem:[%s431_s23 + $0x28] sm:$0xff] %v450_v16 }
  0xd1   : > { %453 = vst [vmem:[%s431_s23 + $0x40] sm:$0xff] %v452_v17 }
  0xd2   : > { %455 = vst [vmem:[%s431_s23 + $0x48] sm:$0xff] %v454_v18 }
  0xd4   : > { %v456_v19 = vld [vmem:[%s750_s13 + $0x30] sm:$0xff] }
  0xd5   : > { %v458_v20 = vld [vmem:[%s750_s13 + $0x38] sm:$0xff]  ;;  %457 = vst [vmem:[%s431_s23 + $0x60] sm:$0xff] %v456_v19 }
  0xd6   : > { %459 = vst [vmem:[%s431_s23 + $0x68] sm:$0xff] %v458_v20 }
  0xd7 PF: > { %p11_p10 = scmp.ge.s32.totalorder %s669_s19, 4   ;;  %s797_s15 = smov %s620_s16 }
  0xd8   : > { %s798_s16 = smov %s680_s22  ;;  %s799_s17 = smov %s669_s19 }
  0xd9   :  { %13 = sbr.rel (!%p11_p10) target bundleno = 2 (0x2), region = 148 }

// kernel: fno_block2d_forward.18
= control target key start
LH: loop header
LB: loop body
LE: loop exit
PB: predicated region body
PF: predicated region fallthrough
CT: control target
= control target key end

     0   :  { %s644_s15 = smov 0   ;;  %s646_s16 = smov 0   ;;  %s782_s0 = inlined_call_operand.vmem [shape: f32[32,512], index: 0, kind: input, shape index: {}]   ;;  %s783_s1 = inlined_call_operand.vmem [shape: f32[32,32], index: 1, kind: input, shape index: {}]   ;;  %s784_s2 = inlined_call_operand.vmem [shape: f32[32,1], index: 2, kind: input, shape index: {}]   ;;  %s785_s3 = inlined_call_operand.vmem [shape: f32[32,512], index: 3, kind: input, shape index: {}]   ;;  %s786_s4 = inlined_call_operand.vmem [shape: f32[32,512], index: 4, kind: output, shape index: {}]  }
   0x1   :  { %s648_s17 = smov 0  }
   0x2 LB: > { %s529_s18 = sadd.s32 4294967295, %s616_s17   ;;  %s661_s19 = sadd.s32 1, %s616_s17   ;;  %s616_s17 = sphi %s648_s17, %s791_s17   ;;  %s612_s16 = sphi %s646_s16, %s790_s16   ;;  %s608_s15 = sphi %s644_s15, %s789_s15  }
   0x3   : > { %s18_s20 = ssub.s32 %s616_s17, %s661_s19  ;;  %s21_s21 = sadd.s32 1, %s612_s16 }
   0x4   : > { %p19_p0 = scmp.eq.s32.totalorder %s18_s20, 0  ;;  %p28_p1 = scmp.ne.s32.totalorder %s612_s16, %s608_s15 }
   0x5   : > { %p29_p2 = scmp.eq.s32.totalorder %s616_s17, 0  ;;  %p126_p3 = scmp.eq.s32.totalorder %s529_s18, 1 }
   0x6   : > { %s672_s22 = scalar_select %p19_p0, %s612_s16, %s21_s21  }
   0x7   : > { %p674_p4 = por %p29_p2, %p28_p1  ;;  %p678_p5 = por %p126_p3, %p28_p1 }
   0x8   : > { %p532_p6 = scmp.ge.s32.totalorder %s616_s17, 2 }
   0xa   : > { %154 = sbr.rel (%p532_p6) target bundleno = 39 (0x27), region = 24 }
   0xf   : > { %157 = sbr.rel (!%p674_p4) target bundleno = 27 (0x1b), region = 28  ;;  %s159_s25 = sand.u32 (%p674_p4), 1, %s612_s16  }
  0x10   : > { %s556_s26 = sshll.u32 (%p674_p4), %s616_s17, 4  ;;  %s533_s27 = sshll.u32 (%p674_p4), %s159_s25, 6 }
  0x11   : > { %s164_s30 = scalar_lea.vmem (%p674_p4), %s782_s0, %s556_s26  ;;  %s161_s5 = scalar_lea.vmem (%p674_p4), [#allocation2], %s533_s27 }
  0x12   : > { %v177_v0 = vld [vmem:[%s164_s30] sm:$0xff] (%p674_p4)  ;;  %v179_v1 = vld [vmem:[%s164_s30 + $0x8] sm:$0xff] (%p674_p4) }
  0x13   : > { %v181_v2 = vld [vmem:[%s164_s30 + $0x20] sm:$0xff] (%p674_p4)  ;;  %178 = vst [vmem:[%s161_s5] sm:$0xff] (%p674_p4), %v177_v0  ;;  %v183_v3 = vld [vmem:[%s164_s30 + $0x28] sm:$0xff] (%p674_p4) }
  0x14   : > { %180 = vst [vmem:[%s161_s5 + $0x8] sm:$0xff] %v179_v1  ;;  %v185_v4 = vld [vmem:[%s164_s30 + $0x40] sm:$0xff]  ;;  %v187_v5 = vld [vmem:[%s164_s30 + $0x48] sm:$0xff] }
  0x15   : > { %182 = vst [vmem:[%s161_s5 + $0x10] sm:$0xff] %v181_v2  ;;  %v189_v6 = vld [vmem:[%s164_s30 + $0x60] sm:$0xff]  ;;  %v191_v7 = vld [vmem:[%s164_s30 + $0x68] sm:$0xff] }
  0x16   : > { %184 = vst [vmem:[%s161_s5 + $0x18] sm:$0xff] %v183_v3 }
  0x17   : > { %186 = vst [vmem:[%s161_s5 + $0x20] sm:$0xff] %v185_v4 }
  0x18   : > { %188 = vst [vmem:[%s161_s5 + $0x28] sm:$0xff] %v187_v5 }
  0x19   : > { %190 = vst [vmem:[%s161_s5 + $0x30] sm:$0xff] %v189_v6 }
  0x1a   : > { %192 = vst [vmem:[%s161_s5 + $0x38] sm:$0xff] %v191_v7 }
  0x1b PF: > { %198 = sbr.rel (!%p674_p4) target bundleno = 39 (0x27), region = 51  ;;  %s200_s6 = sand.u32 (%p674_p4), 1, %s612_s16  }
  0x1c   : > { %s557_s7 = sshll.u32 (%p674_p4), %s616_s17, 4  ;;  %s536_s8 = sshll.u32 (%p674_p4), %s200_s6, 6 }
  0x1d   : > { %s205_s11 = scalar_lea.vmem (%p674_p4), %s785_s3, %s557_s7  ;;  %s202_s12 = scalar_lea.vmem (%p674_p4), [#allocation3], %s536_s8 }
  0x1e   : > { %v218_v8 = vld [vmem:[%s205_s11] sm:$0xff] (%p674_p4)  ;;  %v220_v9 = vld [vmem:[%s205_s11 + $0x8] sm:$0xff] (%p674_p4) }
  0x1f   : > { %v222_v10 = vld [vmem:[%s205_s11 + $0x20] sm:$0xff] (%p674_p4)  ;;  %219 = vst [vmem:[%s202_s12] sm:$0xff] (%p674_p4), %v218_v8  ;;  %v224_v11 = vld [vmem:[%s205_s11 + $0x28] sm:$0xff] (%p674_p4) }
  0x20   : > { %221 = vst [vmem:[%s202_s12 + $0x8] sm:$0xff] %v220_v9  ;;  %v226_v12 = vld [vmem:[%s205_s11 + $0x40] sm:$0xff]  ;;  %v228_v13 = vld [vmem:[%s205_s11 + $0x48] sm:$0xff] }
  0x21   : > { %223 = vst [vmem:[%s202_s12 + $0x10] sm:$0xff] %v222_v10  ;;  %v230_v14 = vld [vmem:[%s205_s11 + $0x60] sm:$0xff]  ;;  %v232_v15 = vld [vmem:[%s205_s11 + $0x68] sm:$0xff] }
  0x22   : > { %225 = vst [vmem:[%s202_s12 + $0x18] sm:$0xff] %v224_v11 }
  0x23   : > { %227 = vst [vmem:[%s202_s12 + $0x20] sm:$0xff] %v226_v12 }
  0x24   : > { %229 = vst [vmem:[%s202_s12 + $0x28] sm:$0xff] %v228_v13 }
  0x25   : > { %231 = vst [vmem:[%s202_s12 + $0x30] sm:$0xff] %v230_v14 }
  0x26   : > { %233 = vst [vmem:[%s202_s12 + $0x38] sm:$0xff] %v232_v15 }
  0x27 PF: > { %p539_p7 = scmp.ge.s32.totalorder %s616_s17, 1  ;;  %p238_p8 = scmp.lt.s32.totalorder %s616_s17, 3 }
  0x29   : > { %p239_p9 = pnand %p539_p7, %p238_p8 }
  0x2a   : > { %s245_s13 = sand.u32 (!%p239_p9), 1, %s608_s15  }
  0x2b   : > { %242 = sbr.rel (%p239_p9) target bundleno = 213 (0xd5), region = 74  ;;  %s700_s14 = sshll.u32 (!%p239_p9), %s245_s13, 6 }
  0x2c   : > { %s247_s26 = scalar_lea.vmem (!%p239_p9), [#allocation2], %s700_s14  ;;  %s736_s12 = scalar_lea.vmem (!%p239_p9), [#allocation3], %s700_s14 }
  0x2d   : > { %s741_s13 = scalar_lea.vmem (!%p239_p9), [#allocation4], %s700_s14 }
  0x30   : > { %v618_v16 = vmov 0   ;;  %v297_v17 = vld [vmem:[%s784_s2 + $0x10] sm:$0xff]  ;;  %v295_v18 = vld [vmem:[%s784_s2] sm:$0xff]  ;;  %v294_v20 = vld [vmem:[%s247_s26 + $0x38] sm:$0xff]  ;;  %vm319_vm0 = vcmask 261120   ;;  %s558_s14 = sshll.u32 (%p678_p5), %s529_s18, 4 }
  0x31   : > { %593 = vset.pattern.permute.xlu1 %v618_v16  ;;  %592 = vset.pattern.permute.xlu0 %v618_v16  ;;  %v293_v19 = vld [vmem:[%s247_s26 + $0x30] sm:$0xff]  ;;  %v291_v21 = vld [vmem:[%s247_s26 + $0x20] sm:$0xff]  ;;  %v292_v22 = vld [vmem:[%s247_s26 + $0x28] sm:$0xff]  ;;  %s423_s23 = scalar_lea.vmem (%p678_p5), %s786_s4, %s558_s14 }
  0x32   : > { %311 = vperm.xlu1 %593, %v297_v17   ;;  %301 = vperm.xlu0 %592, %v295_v18   ;;  %v289_v23 = vld [vmem:[%s247_s26 + $0x10] sm:$0xff]  ;;  %v290_v24 = vld [vmem:[%s247_s26 + $0x18] sm:$0xff]  ;;  %v287_v25 = vld [vmem:[%s247_s26] sm:$0xff] }
  0x33   : > { %344 = vmatpush.msra.mxu0 %v293_v19  ;;  %559 = vmatpush.msra.mxu2 %v293_v19  ;;  %v288_v26 = vld [vmem:[%s247_s26 + $0x8] sm:$0xff]  ;;  %v283_v27 = vld [vmem:[%s783_s1] sm:$0xff]  ;;  %v285_v28 = vld [vmem:[%s783_s1 + $0x10] sm:$0xff] }
  0x34   : > { %373 = vmatpush.msra.mxu1 %v294_v20  ;;  %563 = vmatpush.msra.mxu3 %v294_v20  ;;  %v298_v29 = vld [vmem:[%s784_s2 + $0x18] sm:$0xff]  ;;  %v296_v30 = vld [vmem:[%s784_s2 + $0x8] sm:$0xff]  ;;  %v390_v35 = vld [vmem:[%s736_s12] sm:$0xff] }
  0x35   : > { %345 = vmatpush.msra.mxu0 %v291_v21  ;;  %560 = vmatpush.msra.mxu2 %v291_v21  ;;  %v284_v31 = vld [vmem:[%s783_s1 + $0x8] sm:$0xff]  ;;  %v286_v32 = vld [vmem:[%s783_s1 + $0x18] sm:$0xff]  ;;  %v394_v44 = vld [vmem:[%s736_s12 + $0x20] sm:$0xff] }
  0x36   : > { %374 = vmatpush.msra.mxu1 %v292_v22  ;;  %564 = vmatpush.msra.mxu3 %v292_v22  ;;  %v391_v38 = vld [vmem:[%s736_s12 + $0x8] sm:$0xff]  ;;  %v392_v51 = vld [vmem:[%s736_s12 + $0x10] sm:$0xff]  ;;  %v393_v55 = vld [vmem:[%s736_s12 + $0x18] sm:$0xff] }
  0x37   : > { %346 = vmatpush.msra.mxu0 %v289_v23  ;;  %561 = vmatpush.msra.mxu2 %v289_v23  ;;  %v395_v47 = vld [vmem:[%s736_s12 + $0x28] sm:$0xff]  ;;  %v396_v62 = vld [vmem:[%s736_s12 + $0x30] sm:$0xff]  ;;  %v397_v1 = vld [vmem:[%s736_s12 + $0x38] sm:$0xff] }
  0x38   : > { %375 = vmatpush.msra.mxu1 %v290_v24  ;;  %565 = vmatpush.msra.mxu3 %v290_v24 }
  0x39   : > { %347 = vmatpush.msra.mxu0 %v287_v25  ;;  %562 = vmatpush.msra.mxu2 %v287_v25 }
  0x3a   : > { %376 = vmatpush.msra.mxu1 %v288_v26  ;;  %566 = vmatpush.msra.mxu3 %v288_v26 }
  0x3b   : > { %543 = vmatmul.msk.f32.vlgmr.msra.gmra.mxu0 %vm319_vm0, %v283_v27  ;;  %545 = vmatmul.msk.f32.vlgmr.msra.gmra.mxu2 %vm319_vm0, %v285_v28 }
  0x3c   : > { %547 = vmatmul.msk.f32.vlgmr.msra.gmra.mxu1 %vm319_vm0, %v283_v27  ;;  %549 = vmatmul.msk.f32.vlgmr.msra.gmra.mxu3 %vm319_vm0, %v285_v28 }
  0x3d   : > { %316 = vperm.xlu1 %593, %v298_v29   ;;  %306 = vperm.xlu0 %592, %v296_v30  }
  0x43   : > { %544 = vmatmul.msk.f32.gmra.mxu0 %vm319_vm0, %v284_v31  ;;  %546 = vmatmul.msk.f32.gmra.mxu2 %vm319_vm0, %v286_v32 }
  0x44   : > { %548 = vmatmul.msk.f32.gmra.mxu1 %vm319_vm0, %v284_v31  ;;  %550 = vmatmul.msk.f32.gmra.mxu3 %vm319_vm0, %v286_v32 }
  0xa4   : > { %v302_v33 = vpop.permute.xlu0 %301  ;;  %v312_v41 = vpop.permute.xlu1 %311 }
  0xaf   : > { %v307_v48 = vpop.permute.xlu0 %306  ;;  %v317_v60 = vpop.permute.xlu1 %316 }
  0xb8   : > { %v349_v34 = vpop.f32.mrf.mxu0 }
  0xb9   : > { %v350_v36 = vadd.f32 %v349_v34, %v302_v33  ;;  %v378_v37 = vpop.f32.mrf.mxu1 }
  0xba   : > { %v379_v39 = vadd.f32 %v378_v37, %v302_v33 }
  0xbb   : > { %v398_v40 = vadd.f32 %v390_v35, %v350_v36 }
  0xbc   : > { %v399_v42 = vadd.f32 %v391_v38, %v379_v39 }
  0xbd   : > { %406 = vst [vmem:[%s741_s13] sm:$0xff] %v398_v40 }
  0xbe   : > { %407 = vst [vmem:[%s741_s13 + $0x8] sm:$0xff] %v399_v42  ;;  %v355_v43 = vpop.f32.mrf.mxu2 }
  0xbf   : > { %v356_v45 = vadd.f32 %v355_v43, %v312_v41  ;;  %v384_v46 = vpop.f32.mrf.mxu3 }
  0xc0   : > { %v385_v49 = vadd.f32 %v384_v46, %v312_v41  ;;  %v352_v50 = vpop.f32.mrf.mxu0 }
  0xc1   : > { %v402_v52 = vadd.f32 %v394_v44, %v356_v45  ;;  %v353_v53 = vadd.f32 %v352_v50, %v307_v48  ;;  %v381_v54 = vpop.f32.mrf.mxu1 }
  0xc2   : > { %v403_v56 = vadd.f32 %v395_v47, %v385_v49  ;;  %v382_v57 = vadd.f32 %v381_v54, %v307_v48 }
  0xc3   : > { %410 = vst [vmem:[%s741_s13 + $0x20] sm:$0xff] %v402_v52  ;;  %v400_v58 = vadd.f32 %v392_v51, %v353_v53 }
  0xc4   : > { %411 = vst [vmem:[%s741_s13 + $0x28] sm:$0xff] %v403_v56  ;;  %v401_v59 = vadd.f32 %v393_v55, %v382_v57  ;;  %v436_v5 = vld [vmem:[%s741_s13] sm:$0xff] (%p678_p5) }
  0xc5   : > { %408 = vst [vmem:[%s741_s13 + $0x10] sm:$0xff] %v400_v58  ;;  %v438_v6 = vld [vmem:[%s741_s13 + $0x8] sm:$0xff] (%p678_p5) }
  0xc6   : > { %409 = vst [vmem:[%s741_s13 + $0x18] sm:$0xff] %v401_v59  ;;  %v358_v61 = vpop.f32.mrf.mxu2 }
  0xc7   : > { %v359_v63 = vadd.f32 %v358_v61, %v317_v60  ;;  %v387_v0 = vpop.f32.mrf.mxu3  ;;  %437 = vst [vmem:[%s423_s23] sm:$0xff] (%p678_p5), %v436_v5 }
  0xc8   : > { %v388_v2 = vadd.f32 %v387_v0, %v317_v60  ;;  %420 = sbr.rel (!%p678_p5) target bundleno = 213 (0xd5), region = 86  ;;  %439 = vst [vmem:[%s423_s23 + $0x8] sm:$0xff] (%p678_p5), %v438_v6 }
  0xc9   : > { %v404_v3 = vadd.f32 %v396_v62, %v359_v63 }
  0xca   : > { %v405_v4 = vadd.f32 %v397_v1, %v388_v2  ;;  %v444_v9 = vld [vmem:[%s741_s13 + $0x20] sm:$0xff] (%p678_p5) }
  0xcb   : > { %412 = vst [vmem:[%s741_s13 + $0x30] sm:$0xff] %v404_v3  ;;  %v446_v10 = vld [vmem:[%s741_s13 + $0x28] sm:$0xff] (%p678_p5) }
  0xcc   : > { %413 = vst [vmem:[%s741_s13 + $0x38] sm:$0xff] %v405_v4  ;;  %v440_v7 = vld [vmem:[%s741_s13 + $0x10] sm:$0xff] (%p678_p5) }
  0xcd   : > { %v442_v8 = vld [vmem:[%s741_s13 + $0x18] sm:$0xff]  ;;  %441 = vst [vmem:[%s423_s23 + $0x20] sm:$0xff] %v440_v7 }
  0xce   : > { %443 = vst [vmem:[%s423_s23 + $0x28] sm:$0xff] %v442_v8 }
  0xcf   : > { %445 = vst [vmem:[%s423_s23 + $0x40] sm:$0xff] %v444_v9 }
  0xd0   : > { %447 = vst [vmem:[%s423_s23 + $0x48] sm:$0xff] %v446_v10 }
  0xd2   : > { %v448_v11 = vld [vmem:[%s741_s13 + $0x30] sm:$0xff] }
  0xd3   : > { %v450_v12 = vld [vmem:[%s741_s13 + $0x38] sm:$0xff]  ;;  %449 = vst [vmem:[%s423_s23 + $0x60] sm:$0xff] %v448_v11 }
  0xd4   : > { %451 = vst [vmem:[%s423_s23 + $0x68] sm:$0xff] %v450_v12 }
  0xd5 PF: > { %p11_p10 = scmp.ge.s32.totalorder %s661_s19, 4   ;;  %s789_s15 = smov %s612_s16 }
  0xd6   : > { %s790_s16 = smov %s672_s22  ;;  %s791_s17 = smov %s661_s19 }
  0xd7   :  { %13 = sbr.rel (!%p11_p10) target bundleno = 2 (0x2), region = 148 }

// kernel: fno_block2d_forward.19
= control target key start
LH: loop header
LB: loop body
LE: loop exit
PB: predicated region body
PF: predicated region fallthrough
CT: control target
= control target key end

     0   :  { %s845_s18 = smov 0   ;;  %s847_s19 = smov 0   ;;  %s1077_s0 = inlined_call_operand.vmem [shape: f32[32,512], index: 0, kind: input, shape index: {}]   ;;  %s1078_s1 = inlined_call_operand.vmem [shape: f32[128,32], index: 1, kind: input, shape index: {}]   ;;  %s1079_s2 = inlined_call_operand.vmem [shape: f32[128,1], index: 2, kind: input, shape index: {}]   ;;  %s1080_s3 = inlined_call_operand.vmem [shape: f32[4,128], index: 3, kind: input, shape index: {}]   ;;  %s1081_s4 = inlined_call_operand.vmem [shape: f32[4,1], index: 4, kind: input, shape index: {}]   ;;  %s1082_s5 = inlined_call_operand.vmem [shape: f32[4,512], index: 5, kind: output, shape index: {}]  }
   0x1   :  { %s849_s20 = smov 0  }
   0x2 LB: > { %s708_s21 = sadd.s32 4294967295, %s812_s20   ;;  %s862_s22 = sadd.s32 1, %s812_s20   ;;  %s812_s20 = sphi %s849_s20, %s1085_s20   ;;  %s808_s19 = sphi %s847_s19, %s1084_s19   ;;  %s804_s18 = sphi %s845_s18, %s1083_s18  }
   0x3   : > { %s19_s23 = ssub.s32 %s812_s20, %s862_s22  ;;  %s22_s24 = sadd.s32 1, %s808_s19 }
   0x4   : > { %p20_p0 = scmp.eq.s32.totalorder %s19_s23, 0  ;;  %p29_p1 = scmp.ne.s32.totalorder %s808_s19, %s804_s18 }
   0x5   : > { %p30_p2 = scmp.eq.s32.totalorder %s812_s20, 0  ;;  %p711_p4 = scmp.ge.s32.totalorder %s812_s20, 2 }
   0x6   : > { %s871_s25 = scalar_select %p20_p0, %s808_s19, %s22_s24  }
   0x7   : > { %p31_p3 = por %p30_p2, %p29_p1  ;;  %177 = sbr.rel (%p711_p4) target bundleno = 24 (0x18), region = 32 }
   0xc   : > { %180 = sbr.rel (!%p31_p3) target bundleno = 24 (0x18), region = 36  ;;  %s182_s26 = sand.u32 (%p31_p3), 1, %s808_s19  }
   0xd   : > { %s753_s27 = sshll.u32 (%p31_p3), %s812_s20, 4  ;;  %s712_s28 = sshll.u32 (%p31_p3), %s182_s26, 6 }
   0xe   : > { %s187_s6 = scalar_lea.vmem (%p31_p3), %s1077_s0, %s753_s27  ;;  %s184_s7 = scalar_lea.vmem (%p31_p3), [#allocation2], %s712_s28 }
   0xf   : > { %v200_v0 = vld [vmem:[%s187_s6] sm:$0xff] (%p31_p3)  ;;  %v202_v1 = vld [vmem:[%s187_s6 + $0x8] sm:$0xff] (%p31_p3) }
  0x10   : > { %v204_v2 = vld [vmem:[%s187_s6 + $0x20] sm:$0xff] (%p31_p3)  ;;  %201 = vst [vmem:[%s184_s7] sm:$0xff] (%p31_p3), %v200_v0  ;;  %v206_v3 = vld [vmem:[%s187_s6 + $0x28] sm:$0xff] (%p31_p3) }
  0x11   : > { %203 = vst [vmem:[%s184_s7 + $0x8] sm:$0xff] %v202_v1  ;;  %v208_v4 = vld [vmem:[%s187_s6 + $0x40] sm:$0xff]  ;;  %v210_v5 = vld [vmem:[%s187_s6 + $0x48] sm:$0xff] }
  0x12   : > { %205 = vst [vmem:[%s184_s7 + $0x10] sm:$0xff] %v204_v2  ;;  %v212_v6 = vld [vmem:[%s187_s6 + $0x60] sm:$0xff]  ;;  %v214_v7 = vld [vmem:[%s187_s6 + $0x68] sm:$0xff] }
  0x13   : > { %207 = vst [vmem:[%s184_s7 + $0x18] sm:$0xff] %v206_v3 }
  0x14   : > { %209 = vst [vmem:[%s184_s7 + $0x20] sm:$0xff] %v208_v4 }
  0x15   : > { %211 = vst [vmem:[%s184_s7 + $0x28] sm:$0xff] %v210_v5 }
  0x16   : > { %213 = vst [vmem:[%s184_s7 + $0x30] sm:$0xff] %v212_v6 }
  0x17   : > { %215 = vst [vmem:[%s184_s7 + $0x38] sm:$0xff] %v214_v7 }
  0x18 PF: > { %p715_p5 = scmp.ge.s32.totalorder %s812_s20, 1  ;;  %p220_p6 = scmp.lt.s32.totalorder %s812_s20, 3 }
  0x1a   : > { %p221_p7 = pnand %p715_p5, %p220_p6 }
  0x1b   : > { %s227_s10 = sand.u32 (!%p221_p7), 1, %s804_s18   ;;  %s717_s23 = sshll.u32 (!%p221_p7), %s708_s21, 1 }
  0x1c   : > { %224 = sbr.rel (%p221_p7) target bundleno = 402 (0x192), region = 59  ;;  %s716_s11 = sshll.u32 (!%p221_p7), %s227_s10, 6 }
  0x1d   : > { %s229_s14 = scalar_lea.vmem (!%p221_p7), [#allocation2], %s716_s11  ;;  %p256_p8 = scmp.lt.s32.totalorder (!%p221_p7), %s717_s23, 3 }
  0x21   : > { %v300_v8 = vld [vmem:[%s1079_s2 + $0x78] sm:$0xff]  ;;  %v814_v9 = vmov 0   ;;  %v298_v10 = vld [vmem:[%s1079_s2 + $0x68] sm:$0xff]  ;;  %v283_v11 = vld [vmem:[%s229_s14 + $0x30] sm:$0xff]  ;;  %vm381_vm0 = vcmask 261120   ;;  %s1087_s23 = smov (!%p256_p8, %s717_s23), 3 }
  0x22   : > { %787 = vset.pattern.permute.xlu0 %v814_v9  ;;  %788 = vset.pattern.permute.xlu1 %v814_v9  ;;  %v284_v12 = vld [vmem:[%s229_s14 + $0x38] sm:$0xff]  ;;  %v281_v13 = vld [vmem:[%s229_s14 + $0x20] sm:$0xff]  ;;  %v282_v14 = vld [vmem:[%s229_s14 + $0x28] sm:$0xff]  ;;  %s718_s24 = sshll.u32 %s1087_s23, 2  ;;  %vm642_vm1 = vcmask 1043456  }
  0x23   : > { %378 = vperm.xlu0 %787, %v300_v8   ;;  %368 = vperm.xlu1 %788, %v298_v10   ;;  %v279_v15 = vld [vmem:[%s229_s14 + $0x10] sm:$0xff]  ;;  %v280_v16 = vld [vmem:[%s229_s14 + $0x18] sm:$0xff]  ;;  %v277_v18 = vld [vmem:[%s229_s14] sm:$0xff]  ;;  %s259_s28 = scalar_lea.vmem %s1082_s5, %s718_s24 }
  0x24   : > { %789 = vset.pattern.permute.xlu2 %v814_v9  ;;  %442 = vmatpush.msra.mxu0 %v283_v11  ;;  %v299_v17 = vld [vmem:[%s1079_s2 + $0x70] sm:$0xff]  ;;  %v278_v19 = vld [vmem:[%s229_s14 + $0x8] sm:$0xff]  ;;  %v261_v20 = vld [vmem:[%s1078_s1] sm:$0xff] }
  0x25   : > { %754 = vmatpush.msra.mxu2 %v283_v11  ;;  %507 = vmatpush.msra.mxu1 %v284_v12  ;;  %v271_v21 = vld [vmem:[%s1078_s1 + $0x50] sm:$0xff]  ;;  %v900_v22 = vld [vmem:[%s1078_s1 + $0x48] sm:$0xff]  ;;  %v297_v23 = vld [vmem:[%s1079_s2 + $0x60] sm:$0xff] }
  0x26   : > { %758 = vmatpush.msra.mxu3 %v284_v12  ;;  %443 = vmatpush.msra.mxu0 %v281_v13  ;;  %v296_v24 = vld [vmem:[%s1079_s2 + $0x58] sm:$0xff]  ;;  %v294_v25 = vld [vmem:[%s1079_s2 + $0x48] sm:$0xff]  ;;  %v293_v28 = vld [vmem:[%s1079_s2 + $0x40] sm:$0xff] }
  0x27   : > { %755 = vmatpush.msra.mxu2 %v281_v13  ;;  %508 = vmatpush.msra.mxu1 %v282_v14  ;;  %v262_v26 = vld [vmem:[%s1078_s1 + $0x8] sm:$0xff]  ;;  %v272_v27 = vld [vmem:[%s1078_s1 + $0x58] sm:$0xff]  ;;  %v295_v29 = vld [vmem:[%s1079_s2 + $0x50] sm:$0xff] }
  0x28   : > { %759 = vmatpush.msra.mxu3 %v282_v14  ;;  %444 = vmatpush.msra.mxu0 %v279_v15  ;;  %v291_v30 = vld [vmem:[%s1079_s2 + $0x30] sm:$0xff]  ;;  %v273_v32 = vld [vmem:[%s1078_s1 + $0x60] sm:$0xff]  ;;  %v290_v33 = vld [vmem:[%s1079_s2 + $0x28] sm:$0xff] }
  0x29   : > { %756 = vmatpush.msra.mxu2 %v279_v15  ;;  %509 = vmatpush.msra.mxu1 %v280_v16  ;;  %v263_v31 = vld [vmem:[%s1078_s1 + $0x10] sm:$0xff]  ;;  %v292_v34 = vld [vmem:[%s1079_s2 + $0x38] sm:$0xff]  ;;  %v274_v37 = vld [vmem:[%s1078_s1 + $0x68] sm:$0xff] }
  0x2a   : > { %760 = vmatpush.msra.mxu3 %v280_v16  ;;  %445 = vmatpush.msra.mxu0 %v277_v18  ;;  %v288_v35 = vld [vmem:[%s1079_s2 + $0x18] sm:$0xff]  ;;  %v287_v38 = vld [vmem:[%s1079_s2 + $0x10] sm:$0xff]  ;;  %v289_v39 = vld [vmem:[%s1079_s2 + $0x20] sm:$0xff] }
  0x2b   : > { %373 = vperm.xlu0 %787, %v299_v17   ;;  %757 = vmatpush.msra.mxu2 %v277_v18  ;;  %v264_v36 = vld [vmem:[%s1078_s1 + $0x18] sm:$0xff]  ;;  %v285_v40 = vld [vmem:[%s1079_s2] sm:$0xff]  ;;  %v275_v42 = vld [vmem:[%s1078_s1 + $0x70] sm:$0xff] }
  0x2c   : > { %510 = vmatpush.msra.mxu1 %v278_v19  ;;  %761 = vmatpush.msra.mxu3 %v278_v19  ;;  %v265_v41 = vld [vmem:[%s1078_s1 + $0x20] sm:$0xff]  ;;  %v286_v43 = vld [vmem:[%s1079_s2 + $0x8] sm:$0xff]  ;;  %v276_v46 = vld [vmem:[%s1078_s1 + $0x78] sm:$0xff] }
  0x2d   : > { %719 = vmatmul.msk.f32.vlgmr.msra.gmra.mxu0 %vm381_vm0, %v261_v20  ;;  %729 = vmatmul.msk.f32.vlgmr.msra.gmra.mxu2 %vm381_vm0, %v271_v21  ;;  %v593_v44 = vld [vmem:[%s1081_s4] sm:$0xf]  ;;  %v266_v45 = vld [vmem:[%s1078_s1 + $0x28] sm:$0xff]  ;;  %v267_v47 = vld [vmem:[%s1078_s1 + $0x30] sm:$0xff] }
  0x2e   : > { %735 = vmatmul.msk.f32.vlgmr.msra.gmra.mxu1 %vm381_vm0, %v261_v20  ;;  %744 = vmatmul.msk.f32.vlgmr.msra.gmra.mxu3 %vm381_vm0, %v900_v22  ;;  %v268_v48 = vld [vmem:[%s1078_s1 + $0x38] sm:$0xff]  ;;  %v269_v49 = vld [vmem:[%s1078_s1 + $0x40] sm:$0xff] }
  0x2f   : > { %363 = vperm.xlu1 %788, %v297_v23   ;;  %358 = vperm.xlu2 %789, %v296_v24  }
  0x33   : > { %348 = vperm.xlu0 %787, %v294_v25  }
  0x35   : > { %720 = vmatmul.msk.f32.gmra.mxu0 %vm381_vm0, %v262_v26  ;;  %730 = vmatmul.msk.f32.gmra.mxu2 %vm381_vm0, %v272_v27 }
  0x36   : > { %736 = vmatmul.msk.f32.gmra.mxu1 %vm381_vm0, %v262_v26  ;;  %745 = vmatmul.msk.f32.gmra.mxu3 %vm381_vm0, %v271_v21 }
  0x37   : > { %343 = vperm.xlu1 %788, %v293_v28   ;;  %353 = vperm.xlu2 %789, %v295_v29  }
  0x3b   : > { %333 = vperm.xlu0 %787, %v291_v30  }
  0x3d   : > { %721 = vmatmul.msk.f32.gmra.mxu0 %vm381_vm0, %v263_v31  ;;  %731 = vmatmul.msk.f32.gmra.mxu2 %vm381_vm0, %v273_v32 }
  0x3e   : > { %737 = vmatmul.msk.f32.gmra.mxu1 %vm381_vm0, %v263_v31  ;;  %746 = vmatmul.msk.f32.gmra.mxu3 %vm381_vm0, %v272_v27 }
  0x3f   : > { %328 = vperm.xlu1 %788, %v290_v33   ;;  %338 = vperm.xlu2 %789, %v292_v34  }
  0x43   : > { %318 = vperm.xlu0 %787, %v288_v35  }
  0x45   : > { %722 = vmatmul.msk.f32.gmra.mxu0 %vm381_vm0, %v264_v36  ;;  %732 = vmatmul.msk.f32.gmra.mxu2 %vm381_vm0, %v274_v37 }
  0x46   : > { %738 = vmatmul.msk.f32.gmra.mxu1 %vm381_vm0, %v264_v36  ;;  %747 = vmatmul.msk.f32.gmra.mxu3 %vm381_vm0, %v273_v32 }
  0x47   : > { %313 = vperm.xlu1 %788, %v287_v38   ;;  %323 = vperm.xlu2 %789, %v289_v39  }
  0x4b   : > { %303 = vperm.xlu0 %787, %v285_v40  }
  0x4d   : > { %723 = vmatmul.msk.f32.gmra.mxu0 %vm381_vm0, %v265_v41  ;;  %733 = vmatmul.msk.f32.gmra.mxu2 %vm381_vm0, %v275_v42 }
  0x4e   : > { %739 = vmatmul.msk.f32.gmra.mxu1 %vm381_vm0, %v265_v41  ;;  %748 = vmatmul.msk.f32.gmra.mxu3 %vm381_vm0, %v274_v37 }
  0x4f   : > { %596 = vperm.xlu1 %788, %v593_v44   ;;  %308 = vperm.xlu2 %789, %v286_v43  }
  0x55   : > { %724 = vmatmul.msk.f32.gmra.mxu0 %vm381_vm0, %v266_v45  ;;  %734 = vmatmul.msk.f32.gmra.mxu2 %vm381_vm0, %v276_v46 }
  0x56   : > { %740 = vmatmul.msk.f32.gmra.mxu1 %vm381_vm0, %v266_v45  ;;  %749 = vmatmul.msk.f32.gmra.mxu3 %vm381_vm0, %v275_v42 }
  0x5d   : > { %725 = vmatmul.msk.f32.gmra.mxu0 %vm381_vm0, %v267_v47 }
  0x5e   : > { %741 = vmatmul.msk.f32.gmra.mxu1 %vm381_vm0, %v267_v47  ;;  %750 = vmatmul.msk.f32.gmra.mxu3 %vm381_vm0, %v276_v46 }
  0x65   : > { %726 = vmatmul.msk.f32.gmra.mxu0 %vm381_vm0, %v268_v48 }
  0x66   : > { %742 = vmatmul.msk.f32.gmra.mxu1 %vm381_vm0, %v268_v48 }
  0x6d   : > { %727 = vmatmul.msk.f32.gmra.mxu0 %vm381_vm0, %v269_v49 }
  0x6e   : > { %743 = vmatmul.msk.f32.gmra.mxu1 %vm381_vm0, %v269_v49 }
  0x75   : > { %728 = vmatmul.msk.f32.gmra.mxu0 %vm381_vm0, %v900_v22 }
  0x89   : > { %v359_v9 = vpop.permute.xlu2 %358 }
  0x91   : > { %v354_v22 = vpop.permute.xlu2 %353 }
  0x95   : > { %v379_v0 = vpop.permute.xlu0 %378  ;;  %v369_v5 = vpop.permute.xlu1 %368 }
  0x99   : > { %v339_v39 = vpop.permute.xlu2 %338 }
  0x9d   : > { %v374_v11 = vpop.permute.xlu0 %373 }
  0xa1   : > { %v364_v18 = vpop.permute.xlu1 %363 }
  0xa5   : > { %v349_v23 = vpop.permute.xlu0 %348 }
  0xa9   : > { %v344_v38 = vpop.permute.xlu1 %343 }
  0xaa   : > { %v1017_v50 = vpop.f32.mrf.mxu0 }
  0xab   : > { %v1019_v51 = vpop.f32.mrf.mxu1 }
  0xad   : > { %v334_v42 = vpop.permute.xlu0 %333 }
  0xb0   : > { %v477_v52 = vpop.f32.mrf.mxu2 }
  0xb1   : > { %v1021_v53 = vpop.f32.mrf.mxu3  ;;  %v478_v27 = vadd.f32 %v477_v52, %v354_v22 }
  0xb2   : > { %v1023_v54 = vpop.f32.mrf.mxu0  ;;  %v540_v49 = vadd.f32 %v1021_v53, %v349_v23 }
  0xb3   : > { %v1025_v55 = vpop.f32.mrf.mxu1  ;;  %v580_v37 = vmax.f32 %v478_v27, 0.0 }
  0xb8   : > { %v480_v56 = vpop.f32.mrf.mxu2 }
  0xb9   : > { %v542_v57 = vpop.f32.mrf.mxu3  ;;  %v481_v25 = vadd.f32 %v480_v56, %v359_v9 }
  0xba   : > { %v1027_v58 = vpop.f32.mrf.mxu0  ;;  %v543_v46 = vadd.f32 %v542_v57, %v354_v22 }
  0xbb   : > { %v1029_v59 = vpop.f32.mrf.mxu1  ;;  %v582_v34 = vmax.f32 %v481_v25, 0.0 }
  0xbc   : > { %v581_v56 = vmax.f32 %v543_v46, 0.0 }
  0xc0   : > { %v483_v60 = vpop.f32.mrf.mxu2 }
  0xc1   : > { %v545_v61 = vpop.f32.mrf.mxu3  ;;  %v484_v24 = vadd.f32 %v483_v60, %v364_v18 }
  0xc2   : > { %v1031_v62 = vpop.f32.mrf.mxu0  ;;  %v546_v43 = vadd.f32 %v545_v61, %v359_v9  ;;  %v319_v61 = vpop.permute.xlu0 %318 }
  0xc3   : > { %v1033_v63 = vpop.f32.mrf.mxu1  ;;  %v584_v28 = vmax.f32 %v484_v24, 0.0 }
  0xc4   : > { %v583_v52 = vmax.f32 %v546_v43, 0.0 }
  0xc8   : > { %v486_v1 = vpop.f32.mrf.mxu2 }
  0xc9   : > { %v548_v2 = vpop.f32.mrf.mxu3  ;;  %v487_v19 = vadd.f32 %v486_v1, %v369_v5  ;;  %v579_v1 = vmax.f32 %v540_v49, 0.0 }
  0xca   : > { %v1035_v3 = vpop.f32.mrf.mxu0  ;;  %v549_v40 = vadd.f32 %v548_v2, %v364_v18  ;;  %v324_v2 = vpop.permute.xlu2 %323 }
  0xcb   : > { %v1037_v4 = vpop.f32.mrf.mxu1  ;;  %v586_v26 = vmax.f32 %v487_v19, 0.0  ;;  %v460_v25 = vadd.f32 %v1035_v3, %v324_v2  ;;  %v304_v27 = vpop.permute.xlu0 %303 }
  0xcc   : > { %v585_v47 = vmax.f32 %v549_v40, 0.0 }
  0xd0   : > { %v489_v6 = vpop.f32.mrf.mxu2 }
  0xd1   : > { %v551_v7 = vpop.f32.mrf.mxu3  ;;  %v490_v12 = vadd.f32 %v489_v6, %v374_v11 }
  0xd2   : > { %v1039_v8 = vpop.f32.mrf.mxu0  ;;  %v552_v35 = vadd.f32 %v551_v7, %v369_v5 }
  0xd3   : > { %v1041_v10 = vpop.f32.mrf.mxu1  ;;  %v588_v20 = vmax.f32 %v490_v12, 0.0 }
  0xd4   : > { %v587_v44 = vmax.f32 %v552_v35, 0.0 }
  0xd8   : > { %v492_v13 = vpop.f32.mrf.mxu2 }
  0xd9   : > { %v493_v14 = vadd.f32 %v492_v13, %v379_v0  ;;  %v554_v15 = vpop.f32.mrf.mxu3 }
  0xda   : > { %v1043_v16 = vpop.f32.mrf.mxu0  ;;  %v555_v31 = vadd.f32 %v554_v15, %v374_v11  ;;  %v525_v15 = vadd.f32 %v1037_v4, %v324_v2 }
  0xdb   : > { %v530_v17 = vpop.f32.mrf.mxu1  ;;  %v590_v21 = vmax.f32 %v493_v14, 0.0  ;;  %v466_v18 = vadd.f32 %v1043_v16, %v334_v42  ;;  %v309_v16 = vpop.permute.xlu2 %308 }
  0xdc   : > { %v589_v41 = vmax.f32 %v555_v31, 0.0  ;;  %v531_v7 = vadd.f32 %v530_v17, %v334_v42  ;;  %v522_v17 = vadd.f32 %v1033_v63, %v319_v61  ;;  %v569_v4 = vmax.f32 %v525_v15, 0.0 }
  0xdd   : > { %599 = vmatpush.msrb.mxu2 %v590_v21  ;;  %v457_v63 = vadd.f32 %v1031_v62, %v319_v61  ;;  %v568_v31 = vmax.f32 %v460_v25, 0.0 }
  0xde   : > { %v573_v19 = vmax.f32 %v531_v7, 0.0 }
  0xdf   : > { %600 = vmatpush.msrb.mxu2 %v588_v20 }
  0xe1   : > { %v557_v29 = vpop.f32.mrf.mxu3  ;;  %601 = vmatpush.msrb.mxu2 %v586_v26  ;;  %v572_v26 = vmax.f32 %v466_v18, 0.0 }
  0xe2   : > { %v468_v30 = vpop.f32.mrf.mxu0  ;;  %v558_v32 = vadd.f32 %v557_v29, %v379_v0  ;;  %v329_v0 = vpop.permute.xlu1 %328 }
  0xe3   : > { %v533_v33 = vpop.f32.mrf.mxu1  ;;  %602 = vmatpush.msrb.mxu2 %v584_v28  ;;  %v528_v12 = vadd.f32 %v1041_v10, %v329_v0  ;;  %v469_v53 = vadd.f32 %v468_v30, %v339_v39  ;;  %v463_v21 = vadd.f32 %v1039_v8, %v329_v0  ;;  %v516_v28 = vadd.f32 %v1025_v55, %v309_v16 }
  0xe4   : > { %v591_v36 = vmax.f32 %v558_v32, 0.0  ;;  %v534_v5 = vadd.f32 %v533_v33, %v339_v39  ;;  %v567_v8 = vmax.f32 %v522_v17, 0.0  ;;  %v513_v30 = vadd.f32 %v1019_v51, %v304_v27  ;;  %v592_v51 = vld [vmem:[%s1080_s3] sm:$0xf] }
  0xe5   : > { %603 = vmatpush.msrb.mxu2 %v582_v34  ;;  %v571_v22 = vmax.f32 %v528_v12, 0.0  ;;  %v570_v29 = vmax.f32 %v463_v21, 0.0  ;;  %v451_v32 = vadd.f32 %v1023_v54, %v309_v16  ;;  %v563_v33 = vmax.f32 %v516_v28, 0.0 }
  0xe6   : > { %619 = vmatpush.msrb.mxu3 %v591_v36  ;;  %v575_v13 = vmax.f32 %v534_v5, 0.0  ;;  %v566_v34 = vmax.f32 %v457_v63, 0.0  ;;  %v448_v55 = vadd.f32 %v1017_v50, %v304_v27  ;;  %v561_v62 = vmax.f32 %v513_v30, 0.0 }
  0xe7   : > { %604 = vmatpush.msrb.mxu2 %v580_v37  ;;  %v562_v35 = vmax.f32 %v451_v32, 0.0 }
  0xe8   : > { %620 = vmatpush.msrb.mxu3 %v589_v41  ;;  %v560_v54 = vmax.f32 %v448_v55, 0.0 }
  0xea   : > { %v471_v45 = vpop.f32.mrf.mxu0  ;;  %621 = vmatpush.msrb.mxu3 %v587_v44  ;;  %v314_v10 = vpop.permute.xlu1 %313 }
  0xeb   : > { %v536_v48 = vpop.f32.mrf.mxu1  ;;  %v472_v9 = vadd.f32 %v471_v45, %v344_v38  ;;  %v519_v24 = vadd.f32 %v1029_v59, %v314_v10  ;;  %v454_v59 = vadd.f32 %v1027_v58, %v314_v10 }
  0xec   : > { %622 = vmatpush.msrb.mxu3 %v585_v47  ;;  %v537_v60 = vadd.f32 %v536_v48, %v344_v38 }
  0xed   : > { %v576_v20 = vmax.f32 %v472_v9, 0.0  ;;  %v565_v3 = vmax.f32 %v519_v24, 0.0  ;;  %v564_v58 = vmax.f32 %v454_v59, 0.0 }
  0xee   : > { %623 = vmatpush.msrb.mxu3 %v583_v52  ;;  %v577_v57 = vmax.f32 %v537_v60, 0.0 }
  0xf0   : > { %624 = vmatpush.msrb.mxu3 %v581_v56 }
  0xf2   : > { %v474_v6 = vpop.f32.mrf.mxu0  ;;  %625 = vmatpush.msrb.mxu3 %v579_v1  ;;  %v597_v50 = vpop.permute.xlu1 %596 }
  0xf3   : > { %v475_v11 = vadd.f32 %v474_v6, %v349_v23  ;;  %v574_v23 = vmax.f32 %v469_v53, 0.0 }
  0xf4   : > { %626 = vmatpush.msrb.mxu3 %v577_v57 }
  0xf5   : > { %v578_v14 = vmax.f32 %v475_v11, 0.0 }
  0xf6   : > { %627 = vmatpush.msrb.mxu3 %v575_v13 }
  0xf7   : > { %605 = vmatpush.msrb.mxu2 %v578_v14 }
  0xf8   : > { %628 = vmatpush.msrb.mxu3 %v573_v19 }
  0xf9   : > { %606 = vmatpush.msrb.mxu2 %v576_v20 }
  0xfa   : > { %629 = vmatpush.msrb.mxu3 %v571_v22 }
  0xfb   : > { %607 = vmatpush.msrb.mxu2 %v574_v23 }
  0xfc   : > { %630 = vmatpush.msrb.mxu3 %v569_v4 }
  0xfd   : > { %608 = vmatpush.msrb.mxu2 %v572_v26 }
  0xfe   : > { %631 = vmatpush.msrb.mxu3 %v567_v8 }
  0xff   : > { %609 = vmatpush.msrb.mxu2 %v570_v29 }
 0x100   : > { %632 = vmatpush.msrb.mxu3 %v565_v3 }
 0x101   : > { %610 = vmatpush.msrb.mxu2 %v568_v31 }
 0x102   : > { %633 = vmatpush.msrb.mxu3 %v563_v33 }
 0x103   : > { %611 = vmatpush.msrb.mxu2 %v566_v34 }
 0x104   : > { %634 = vmatpush.msrb.mxu3 %v561_v62 }
 0x105   : > { %612 = vmatpush.msrb.mxu2 %v564_v58  ;;  %635 = vmatmul.f32.vlgmr.msrb.gmra.mxu3 %v592_v51 }
 0x107   : > { %613 = vmatpush.msrb.mxu2 %v562_v35 }
 0x109   : > { %614 = vmatpush.msrb.mxu2 %v560_v54 }
 0x10a   : > { %615 = vmatmul.f32.vlgmr.msrb.gmra.mxu2 %v592_v51 }
 0x188   : > { %v636_v36 = vpop.f32.mrf.mxu3 }
 0x189   : > { %v637_v37 = vadd.f32 %v636_v36, %v597_v50 }
 0x18b   : > { %v641_v39 = vrot.slane %v637_v37, 4 }
 0x18d   : > { %v616_v38 = vpop.f32.mrf.mxu2 }
 0x18e   : > { %v617_v40 = vadd.f32 %v616_v38, %v597_v50 }
 0x190   : > { %v643_v41 = vsel %vm642_vm1, %v617_v40, %v641_v39 }
 0x191   : > { %645 = vst [vmem:[%s259_s28] sm:$0xff] %v643_v41 }
 0x192 PF: > { %p12_p9 = scmp.ge.s32.totalorder %s862_s22, 4   ;;  %s1083_s18 = smov %s808_s19 }
 0x193   : > { %s1084_s19 = smov %s871_s25  ;;  %s1085_s20 = smov %s862_s22 }
 0x194   :  { %14 = sbr.rel (!%p12_p9) target bundleno = 2 (0x2), region = 98 }

</bundles_post_ra>
